<compile_context>
chip_gen: v7x
topology: tpu7x:2x2x1
jax: 0.10.0
libtpu: 0.0.40
codegen_flags: <defaults>
</compile_context>

<pallas_src>
import functools

import jax
import jax.numpy as jnp
from jax.experimental import pallas as pl
from jax.experimental.pallas import tpu as pltpu

MIN_NORM = 1e-15
ARTANH_EPS = 1e-5     # geoopt/pvae f32 artanh clamp
BALL_EPS = 4e-3       # geoopt f32 projx boundary eps
CURV = 1.0            # Poincare-ball curvature c


# ---------------------------------------------------------------------------
# Kernel
# ---------------------------------------------------------------------------
def _mobius_encoder_kernel(*refs, num_hidden, z):
    """One batch tile of the full MobiusEncoder forward pass."""
    if num_hidden > 0:
        (x_ref, w0_ref, b0_ref, wh_ref, bh_ref,
         whd_ref, bhd_ref, out_ref) = refs
    else:
        (x_ref, w0_ref, b0_ref, whd_ref, bhd_ref, out_ref) = refs
        wh_ref = bh_ref = None

    # ---- Euclidean encoder: Linear -> ReLU -> Dropout(eval = identity) -----
    # TODO(synk): Dropout is treated as inference-mode identity; training-mode
    # dropout masks would need pltpu.prng_* inside the kernel.
    h = x_ref[...].astype(jnp.bfloat16)                             # (TB, Xin)
    h = jnp.dot(h, w0_ref[...],
                preferred_element_type=jnp.float32) + b0_ref[...]   # (TB, H) f32
    h = jnp.maximum(h, 0.0)
    for i in range(num_hidden):                 # static unroll, num_hidden small
        h = jnp.dot(h.astype(jnp.bfloat16), wh_ref[i],
                    preferred_element_type=jnp.float32) + bh_ref[i]
        h = jnp.maximum(h, 0.0)

    # ---- packed head: single (H, Zp2) matmul --------------------------------
    #   lanes [0, z)  : e @ W_mob_eff.T        lanes [z, 2z) : sigma pre-act
    he = jnp.dot(h.astype(jnp.bfloat16), whd_ref[...],
                 preferred_element_type=jnp.float32)                # (TB, Zp2)
    lane = jax.lax.broadcasted_iota(jnp.int32, he.shape, dimension=1)
    mob_mask = lane < z
    mv = jnp.where(mob_mask, he, 0.0)           # mobius matvec, zero elsewhere

    sqrt_c = jnp.float32(CURV) ** 0.5

    # ---- mobius_matvec(W_eff, e) --------------------------------------------
    # res = tanh(||Me||/||e|| * artanh(sqrt_c*||e||)) * Me / (sqrt_c*||Me||)
    x_n2 = jnp.sum(h * h, axis=-1, keepdims=True)                   # (TB, 1)
    x_norm = jnp.maximum(jnp.sqrt(x_n2), MIN_NORM)
    mx_n2 = jnp.sum(mv * mv, axis=-1, keepdims=True)                # (TB, 1)
    mx_norm = jnp.maximum(jnp.sqrt(mx_n2), MIN_NORM)

    t = jnp.minimum(sqrt_c * x_norm, 1.0 - ARTANH_EPS)              # artanh clamp
    artanh_t = 0.5 * jnp.log((1.0 + t) / (1.0 - t))                 # one fused log
    inv_x = pl.reciprocal(x_norm, approx=True)                      # EUP, slack ok
    scale = jnp.tanh(mx_norm * inv_x * artanh_t) / (mx_norm * sqrt_c)
    mu_tan = scale * mv                          # exact 0 where mv == 0 (padding)

    # ---- expmap0 (+ projx) on the Poincare ball -----------------------------
    u_n2 = jnp.sum(mu_tan * mu_tan, axis=-1, keepdims=True)
    u_norm = jnp.maximum(jnp.sqrt(u_n2), MIN_NORM)
    tv = jnp.tanh(sqrt_c * u_norm)                                  # = sqrt_c*||mu||
    mu = mu_tan * (tv / (sqrt_c * u_norm))                          # exact divide
    clip = jnp.minimum(1.0, (1.0 - BALL_EPS) / jnp.maximum(tv, MIN_NORM))
    mu = mu * clip

    # ---- log_Sigma = softplus(sigma_out(e)), numerically stable -------------
    sg = he + bhd_ref[...]                       # bias only live in lanes [z, 2z)
    logsig = jnp.maximum(sg, 0.0) + jnp.log(1.0 + jnp.exp(-jnp.abs(sg)))

    # single lane-dense output slab: mu in lanes [0, z), log_Sigma in [z, 2z)
    out_ref[...] = jnp.where(mob_mask, mu, logsig)


# ---------------------------------------------------------------------------
# Wrapper
# ---------------------------------------------------------------------------
def _round_up(n, m):
    return pl.cdiv(n, m) * m


def mobius_encoder(x, params, *, block_b_max=512):
    """Returns (mu, log_Sigma), each (B, Z)."""
    B, Xin = x.shape
    H = params["w0"].shape[1]
    Z, Zp2 = params["z"], params["zp2"]
    NH = 0 if params["w_hid"] is None else params["w_hid"].shape[0]

    # Derive the batch tile from B: at least 2 grid steps when B allows so both
    # v7x TensorCores get work (harmless short sequential loop on v5e/v6e), and
    # at most ~8*n_steps rows of padding instead of a whole extra tile.
    # On v6e/v5e with very large B, raising block_b_max toward 1024-2048 (with
    # an explicit vmem_limit_bytes on v7x) amortises the ~0.35us/step overhead.
    n_steps = max(1, pl.cdiv(B, block_b_max))
    if B >= 16 and n_steps < 2:
        n_steps = 2
    block_b = _round_up(pl.cdiv(B, n_steps), 8)
    Bp = block_b * n_steps
    xp = x if Bp == B else jnp.pad(x, ((0, Bp - B), (0, 0)))
    grid = (n_steps,)

    in_specs = [
        pl.BlockSpec((block_b, Xin), lambda i: (i, 0)),   # x (batch-tiled)
        pl.BlockSpec((Xin, H), lambda i: (0, 0)),         # W0 (pre-transposed, bf16)
        pl.BlockSpec((1, H), lambda i: (0, 0)),           # b0
    ]
    inputs = [xp, params["w0"], params["b0"]]
    if NH > 0:
        in_specs += [pl.BlockSpec((NH, H, H), lambda i: (0, 0, 0)),
                     pl.BlockSpec((NH, 1, H), lambda i: (0, 0, 0))]
        inputs += [params["w_hid"], params["b_hid"]]
    in_specs += [pl.BlockSpec((H, Zp2), lambda i: (0, 0)),  # packed [W_mob.T | W_sig.T]
                 pl.BlockSpec((1, Zp2), lambda i: (0, 0))]  # packed sigma bias
    inputs += [params["w_head"], params["b_head"]]

    kernel = functools.partial(_mobius_encoder_kernel, num_hidden=NH, z=Z)
    out = pl.pallas_call(
        kernel,
        out_shape=jax.ShapeDtypeStruct((Bp, Zp2), jnp.float32),
        grid_spec=pltpu.PrefetchScalarGridSpec(
            num_scalar_prefetch=0,
            grid=grid,
            in_specs=in_specs,
            out_specs=pl.BlockSpec((block_b, Zp2), lambda i: (i, 0)),
        ),
        compiler_params=pltpu.CompilerParams(
            dimension_semantics=("parallel",)),
    )(*inputs)

    return out[:B, :Z], out[:B, Z:2 * Z]


# ---------------------------------------------------------------------------
# Parameter preparation (plain-JAX glue, all grid-invariant work hoisted here)
# ---------------------------------------------------------------------------
def _expmap0(v, c=CURV):
    sqrt_c = c ** 0.5
    n = jnp.maximum(jnp.linalg.norm(v, axis=-1, keepdims=True), MIN_NORM)
    return jnp.tanh(sqrt_c * n) * v / (sqrt_c * n)


def prepare_params(enc_ws, enc_bs, mob_w, mob_b, sig_w, sig_b):
    """PyTorch-layout params -> kernel-ready (pre-transposed, packed, padded)."""
    w0 = enc_ws[0].T.astype(jnp.bfloat16)                     # (Xin, H)
    b0 = enc_bs[0].reshape(1, -1).astype(jnp.float32)
    if len(enc_ws) > 1:
        w_hid = jnp.stack([w.T for w in enc_ws[1:]]).astype(jnp.bfloat16)
        b_hid = jnp.stack([b.reshape(1, -1) for b in enc_bs[1:]]).astype(jnp.float32)
    else:
        w_hid = b_hid = None

    # MobiusLayer re-parameterisation (pvae RiemannianLayer): p = expmap0(w*b),
    # effective weight = transp0(p, w) = w * clamp(1 - c*||p||^2).
    p = _expmap0(mob_w * mob_b)                                # (Z, H)
    scale = jnp.maximum(1.0 - CURV * jnp.sum(p * p, axis=-1, keepdims=True),
                        MIN_NORM)
    w_mob_eff = mob_w * scale                                  # (Z, H)

    Z, H = mob_w.shape
    Zp2 = _round_up(2 * Z, 128)                                # one lane-dense slab

    w_head = jnp.zeros((H, Zp2), jnp.float32)
    w_head = w_head.at[:, :Z].set(w_mob_eff.T)                 # mobius lanes [0, Z)
    w_head = w_head.at[:, Z:2 * Z].set(sig_w.T)                # sigma  lanes [Z, 2Z)
    w_head = w_head.astype(jnp.bfloat16)
    b_head = jnp.zeros((1, Zp2), jnp.float32)
    b_head = b_head.at[:, Z:2 * Z].set(sig_b.reshape(1, -1))

    params = dict(w0=w0, b0=b0, w_hid=w_hid, b_hid=b_hid,
                  w_head=w_head, b_head=b_head, z=Z, zp2=Zp2)
    return params, w_mob_eff


# ---------------------------------------------------------------------------
# Pure-JAX reference (f32 everywhere) for validation
# ---------------------------------------------------------------------------
def reference_forward(x, enc_ws, enc_bs, w_mob_eff, sig_w, sig_b, c=CURV):
    h = x
    for w, b in zip(enc_ws, enc_bs):
        h = jnp.maximum(h @ w.T + b, 0.0)
    e = h
    sqrt_c = c ** 0.5
    mv = e @ w_mob_eff.T
    x_norm = jnp.maximum(jnp.linalg.norm(e, axis=-1, keepdims=True), MIN_NORM)
    mx_norm = jnp.maximum(jnp.linalg.norm(mv, axis=-1, keepdims=True), MIN_NORM)
    t = jnp.minimum(sqrt_c * x_norm, 1.0 - ARTANH_EPS)
    artanh_t = 0.5 * (jnp.log(1.0 + t) - jnp.log(1.0 - t))
    res_c = jnp.tanh(mx_norm / x_norm * artanh_t) * mv / (mx_norm * sqrt_c)
    cond = jnp.all(mv == 0.0, axis=-1, keepdims=True)
    mu_tan = jnp.where(cond, 0.0, res_c)
    u_norm = jnp.maximum(jnp.linalg.norm(mu_tan, axis=-1, keepdims=True), MIN_NORM)
    tv = jnp.tanh(sqrt_c * u_norm)
    mu = mu_tan * (tv / (sqrt_c * u_norm))
    mu = mu * jnp.minimum(1.0, (1.0 - BALL_EPS) / jnp.maximum(tv, MIN_NORM))
    sg = e @ sig_w.T + sig_b
    log_sigma = jnp.maximum(sg, 0.0) + jnp.log(1.0 + jnp.exp(-jnp.abs(sg)))
    return mu, log_sigma


if __name__ == "__main__":
    # Small shapes consistent with the module: (batch, input_dim) Euclidean data.
    B, Xin, H, Z = 256, 64, 128, 16
    n_hlayers = 2                     # -> 1 extra hidden Linear(H, H)

    key = jax.random.PRNGKey(0)
    ks = jax.random.split(key, 8)

    x = jax.random.normal(ks[0], (B, Xin), jnp.float32)

    lim0, limh = 1.0 / (Xin ** 0.5), 1.0 / (H ** 0.5)
    enc_ws = [jax.random.uniform(ks[1], (H, Xin), jnp.float32, -lim0, lim0)]
    enc_bs = [jax.random.uniform(ks[2], (H,), jnp.float32, -lim0, lim0)]
    for i in range(n_hlayers - 1):
        kw, kb = jax.random.split(jax.random.fold_in(ks[3], i))
        enc_ws.append(jax.random.uniform(kw, (H, H), jnp.float32, -limh, limh))
        enc_bs.append(jax.random.uniform(kb, (H,), jnp.float32, -limh, limh))
    sig_w = jax.random.uniform(ks[4], (Z, H), jnp.float32, -limh, limh)
    sig_b = jax.random.uniform(ks[5], (Z,), jnp.float32, -limh, limh)
    mob_w = 0.3 * jax.random.normal(ks[6], (Z, H), jnp.float32)   # MobiusLayer._weight
    mob_b = 0.3 * jax.random.normal(ks[7], (Z, 1), jnp.float32)   # MobiusLayer._bias

    params, w_mob_eff = prepare_params(enc_ws, enc_bs, mob_w, mob_b, sig_w, sig_b)

    # B=256 with block_b_max=512 -> 2 grid steps of 128 rows: both v7x
    # TensorCores get work; on v5e/v6e it is a short sequential loop.
    mu, log_sigma = mobius_encoder(x, params, block_b_max=512)
    mu, log_sigma = jax.block_until_ready((mu, log_sigma))

    mu_ref, sig_ref = reference_forward(x, enc_ws, enc_bs, w_mob_eff, sig_w, sig_b)

    assert mu.shape == (B, Z) and log_sigma.shape == (B, Z)
    assert bool(jnp.all(jnp.isfinite(mu))) and bool(jnp.all(jnp.isfinite(log_sigma)))
    assert bool(jnp.all(jnp.sum(mu * mu, axis=-1) < 1.0))  # mu stays on the ball
    err_mu = float(jnp.max(jnp.abs(mu - mu_ref)))
    err_sig = float(jnp.max(jnp.abs(log_sigma - sig_ref)))
    assert err_mu < 5e-2 and err_sig < 5e-2, (err_mu, err_sig)
    print("KERNEL_OK")
</pallas_src>

<mosaic_0001>
module attributes {stable_mosaic.version = 11 : i64} {
  func.func @_mobius_encoder_kernel(%arg0: i32, %arg1: memref<128x64xf32, #tpu.memory_space<vmem>>, %arg2: memref<64x128xbf16, #tpu.memory_space<vmem>>, %arg3: memref<1x128xf32, #tpu.memory_space<vmem>>, %arg4: memref<1x128x128xbf16, #tpu.memory_space<vmem>>, %arg5: memref<1x1x128xf32, #tpu.memory_space<vmem>>, %arg6: memref<128x128xbf16, #tpu.memory_space<vmem>>, %arg7: memref<1x128xf32, #tpu.memory_space<vmem>>, %arg8: memref<128x128xf32, #tpu.memory_space<vmem>>) attributes {dimension_semantics = [#tpu.dimension_semantics<parallel>], iteration_bounds = array<i64: 2>, scalar_prefetch = 0 : i64, scratch_operands = 0 : i64, tpu.core_type = #tpu.core_type<tc>, window_params = [{transform_indices = @transform_0, window_bounds = array<i64: 128, 64>}, {pipeline_mode = #tpu.pipeline_mode<synchronous>, transform_indices = @transform_1, window_bounds = array<i64: 64, 128>}, {pipeline_mode = #tpu.pipeline_mode<synchronous>, transform_indices = @transform_2, window_bounds = array<i64: 1, 128>}, {pipeline_mode = #tpu.pipeline_mode<synchronous>, transform_indices = @transform_3, window_bounds = array<i64: 1, 128, 128>}, {pipeline_mode = #tpu.pipeline_mode<synchronous>, transform_indices = @transform_4, window_bounds = array<i64: 1, 1, 128>}, {pipeline_mode = #tpu.pipeline_mode<synchronous>, transform_indices = @transform_5, window_bounds = array<i64: 128, 128>}, {pipeline_mode = #tpu.pipeline_mode<synchronous>, transform_indices = @transform_6, window_bounds = array<i64: 1, 128>}, {transform_indices = @transform_7, window_bounds = array<i64: 128, 128>}]} {
    %c0 = arith.constant 0 : index
    %c0_0 = arith.constant 0 : index
    %0 = vector.load %arg1[%c0, %c0_0] : memref<128x64xf32, #tpu.memory_space<vmem>>, vector<128x64xf32>
    %1 = arith.truncf %0 : vector<128x64xf32> to vector<128x64xbf16>
    %c0_1 = arith.constant 0 : index
    %c0_2 = arith.constant 0 : index
    %2 = vector.load %arg2[%c0_1, %c0_2] : memref<64x128xbf16, #tpu.memory_space<vmem>>, vector<64x128xbf16>
    %cst = arith.constant dense<0.000000e+00> : vector<128x128xf32>
    %3 = tpu.matmul %1, %2, %cst {dimension_numbers = #tpu.dot_dimension_numbers<[1], [0], [0], [1], [0, 0, 1, 1], [], []>} : vector<128x64xbf16>, vector<64x128xbf16>, vector<128x128xf32> -> vector<128x128xf32>
    %c0_3 = arith.constant 0 : index
    %c0_4 = arith.constant 0 : index
    %4 = vector.load %arg3[%c0_3, %c0_4] : memref<1x128xf32, #tpu.memory_space<vmem>>, vector<1x128xf32>
    %5 = vector.broadcast %4 : vector<1x128xf32> to vector<128x128xf32>
    %6 = arith.addf %3, %5 : vector<128x128xf32>
    %cst_5 = arith.constant 0.000000e+00 : f32
    %7 = vector.broadcast %cst_5 : f32 to vector<128x128xf32>
    %8 = arith.maximumf %6, %7 : vector<128x128xf32>
    %9 = arith.truncf %8 : vector<128x128xf32> to vector<128x128xbf16>
    %c0_6 = arith.constant 0 : index
    %c0_7 = arith.constant 0 : index
    %c0_8 = arith.constant 0 : index
    %10 = vector.load %arg4[%c0_6, %c0_7, %c0_8] : memref<1x128x128xbf16, #tpu.memory_space<vmem>>, vector<1x128x128xbf16>
    %11 = vector.shape_cast %10 : vector<1x128x128xbf16> to vector<128x128xbf16>
    %cst_9 = arith.constant dense<0.000000e+00> : vector<128x128xf32>
    %12 = tpu.matmul %9, %11, %cst_9 {dimension_numbers = #tpu.dot_dimension_numbers<[1], [0], [0], [1], [0, 0, 1, 1], [], []>} : vector<128x128xbf16>, vector<128x128xbf16>, vector<128x128xf32> -> vector<128x128xf32>
    %c0_10 = arith.constant 0 : index
    %c0_11 = arith.constant 0 : index
    %c0_12 = arith.constant 0 : index
    %13 = vector.load %arg5[%c0_10, %c0_11, %c0_12] : memref<1x1x128xf32, #tpu.memory_space<vmem>>, vector<1x1x128xf32>
    %14 = vector.shape_cast %13 : vector<1x1x128xf32> to vector<1x128xf32>
    %15 = vector.broadcast %14 : vector<1x128xf32> to vector<128x128xf32>
    %16 = arith.addf %12, %15 : vector<128x128xf32>
    %cst_13 = arith.constant 0.000000e+00 : f32
    %17 = vector.broadcast %cst_13 : f32 to vector<128x128xf32>
    %18 = arith.maximumf %16, %17 : vector<128x128xf32>
    %19 = arith.truncf %18 : vector<128x128xf32> to vector<128x128xbf16>
    %c0_14 = arith.constant 0 : index
    %c0_15 = arith.constant 0 : index
    %20 = vector.load %arg6[%c0_14, %c0_15] : memref<128x128xbf16, #tpu.memory_space<vmem>>, vector<128x128xbf16>
    %cst_16 = arith.constant dense<0.000000e+00> : vector<128x128xf32>
    %21 = tpu.matmul %19, %20, %cst_16 {dimension_numbers = #tpu.dot_dimension_numbers<[1], [0], [0], [1], [0, 0, 1, 1], [], []>} : vector<128x128xbf16>, vector<128x128xbf16>, vector<128x128xf32> -> vector<128x128xf32>
    %22 = tpu.iota {dimensions = array<i32: 1>} : vector<128x128xi32>
    %c16_i32 = arith.constant 16 : i32
    %23 = vector.broadcast %c16_i32 : i32 to vector<128x128xi32>
    %24 = arith.cmpi slt, %22, %23 : vector<128x128xi32>
    %cst_17 = arith.constant 0.000000e+00 : f32
    %25 = vector.broadcast %cst_17 : f32 to vector<128x128xf32>
    %26 = arith.select %24, %21, %25 : vector<128x128xi1>, vector<128x128xf32>
    %cst_18 = arith.constant 1.000000e+00 : f32
    %cst_19 = arith.constant 5.000000e-01 : f32
    %27 = math.powf %cst_18, %cst_19 : f32
    %28 = arith.mulf %18, %18 : vector<128x128xf32>
    %cst_20 = arith.constant dense<0.000000e+00> : vector<128xf32>
    %29 = vector.multi_reduction <add>, %28, %cst_20 [1] : vector<128x128xf32> to vector<128xf32>
    %30 = vector.shape_cast %29 : vector<128xf32> to vector<128x1xf32>
    %31 = math.sqrt %30 : vector<128x1xf32>
    %cst_21 = arith.constant 1.000000e-15 : f32
    %32 = vector.broadcast %cst_21 : f32 to vector<128x1xf32>
    %33 = arith.maximumf %31, %32 : vector<128x1xf32>
    %34 = arith.mulf %26, %26 : vector<128x128xf32>
    %cst_22 = arith.constant dense<0.000000e+00> : vector<128xf32>
    %35 = vector.multi_reduction <add>, %34, %cst_22 [1] : vector<128x128xf32> to vector<128xf32>
    %36 = vector.shape_cast %35 : vector<128xf32> to vector<128x1xf32>
    %37 = math.sqrt %36 : vector<128x1xf32>
    %cst_23 = arith.constant 1.000000e-15 : f32
    %38 = vector.broadcast %cst_23 : f32 to vector<128x1xf32>
    %39 = arith.maximumf %37, %38 : vector<128x1xf32>
    %40 = vector.broadcast %27 : f32 to vector<128x1xf32>
    %41 = arith.mulf %40, %33 : vector<128x1xf32>
    %cst_24 = arith.constant 0.999989986 : f32
    %42 = vector.broadcast %cst_24 : f32 to vector<128x1xf32>
    %43 = arith.minimumf %41, %42 : vector<128x1xf32>
    %cst_25 = arith.constant 1.000000e+00 : f32
    %44 = vector.broadcast %cst_25 : f32 to vector<128x1xf32>
    %45 = arith.addf %44, %43 : vector<128x1xf32>
    %cst_26 = arith.constant 1.000000e+00 : f32
    %46 = vector.broadcast %cst_26 : f32 to vector<128x1xf32>
    %47 = arith.subf %46, %43 : vector<128x1xf32>
    %48 = arith.divf %45, %47 : vector<128x1xf32>
    %49 = math.log %48 : vector<128x1xf32>
    %cst_27 = arith.constant 5.000000e-01 : f32
    %50 = vector.broadcast %cst_27 : f32 to vector<128x1xf32>
    %51 = arith.mulf %50, %49 : vector<128x1xf32>
    %52 = tpu.reciprocal %33 {approx = true} : vector<128x1xf32> -> vector<128x1xf32>
    %53 = arith.mulf %39, %52 : vector<128x1xf32>
    %54 = arith.mulf %53, %51 : vector<128x1xf32>
    %55 = math.tanh %54 : vector<128x1xf32>
    %56 = vector.broadcast %27 : f32 to vector<128x1xf32>
    %57 = arith.mulf %39, %56 : vector<128x1xf32>
    %58 = arith.divf %55, %57 : vector<128x1xf32>
    %59 = vector.broadcast %58 : vector<128x1xf32> to vector<128x128xf32>
    %60 = arith.mulf %59, %26 : vector<128x128xf32>
    %61 = arith.mulf %60, %60 : vector<128x128xf32>
    %cst_28 = arith.constant dense<0.000000e+00> : vector<128xf32>
    %62 = vector.multi_reduction <add>, %61, %cst_28 [1] : vector<128x128xf32> to vector<128xf32>
    %63 = vector.shape_cast %62 : vector<128xf32> to vector<128x1xf32>
    %64 = math.sqrt %63 : vector<128x1xf32>
    %cst_29 = arith.constant 1.000000e-15 : f32
    %65 = vector.broadcast %cst_29 : f32 to vector<128x1xf32>
    %66 = arith.maximumf %64, %65 : vector<128x1xf32>
    %67 = vector.broadcast %27 : f32 to vector<128x1xf32>
    %68 = arith.mulf %67, %66 : vector<128x1xf32>
    %69 = math.tanh %68 : vector<128x1xf32>
    %70 = vector.broadcast %27 : f32 to vector<128x1xf32>
    %71 = arith.mulf %70, %66 : vector<128x1xf32>
    %72 = arith.divf %69, %71 : vector<128x1xf32>
    %73 = vector.broadcast %72 : vector<128x1xf32> to vector<128x128xf32>
    %74 = arith.mulf %60, %73 : vector<128x128xf32>
    %cst_30 = arith.constant 1.000000e-15 : f32
    %75 = vector.broadcast %cst_30 : f32 to vector<128x1xf32>
    %76 = arith.maximumf %69, %75 : vector<128x1xf32>
    %cst_31 = arith.constant 0.995999991 : f32
    %77 = vector.broadcast %cst_31 : f32 to vector<128x1xf32>
    %78 = arith.divf %77, %76 : vector<128x1xf32>
    %cst_32 = arith.constant 1.000000e+00 : f32
    %79 = vector.broadcast %cst_32 : f32 to vector<128x1xf32>
    %80 = arith.minimumf %79, %78 : vector<128x1xf32>
    %81 = vector.broadcast %80 : vector<128x1xf32> to vector<128x128xf32>
    %82 = arith.mulf %74, %81 : vector<128x128xf32>
    %c0_33 = arith.constant 0 : index
    %c0_34 = arith.constant 0 : index
    %83 = vector.load %arg7[%c0_33, %c0_34] : memref<1x128xf32, #tpu.memory_space<vmem>>, vector<1x128xf32>
    %84 = vector.broadcast %83 : vector<1x128xf32> to vector<128x128xf32>
    %85 = arith.addf %21, %84 : vector<128x128xf32>
    %cst_35 = arith.constant 0.000000e+00 : f32
    %86 = vector.broadcast %cst_35 : f32 to vector<128x128xf32>
    %87 = arith.maximumf %85, %86 : vector<128x128xf32>
    %88 = math.absf %85 : vector<128x128xf32>
    %cst_36 = arith.constant 0.000000e+00 : f32
    %89 = vector.broadcast %cst_36 : f32 to vector<128x128xf32>
    %90 = arith.subf %89, %88 : vector<128x128xf32>
    %91 = math.exp %90 : vector<128x128xf32>
    %cst_37 = arith.constant 1.000000e+00 : f32
    %92 = vector.broadcast %cst_37 : f32 to vector<128x128xf32>
    %93 = arith.addf %92, %91 : vector<128x128xf32>
    %94 = math.log %93 : vector<128x128xf32>
    %95 = arith.addf %87, %94 : vector<128x128xf32>
    %96 = arith.select %24, %82, %95 : vector<128x128xi1>, vector<128x128xf32>
    %c0_38 = arith.constant 0 : index
    %c0_39 = arith.constant 0 : index
    %97 = vector.load %arg8[%c0_38, %c0_39] : memref<128x128xf32, #tpu.memory_space<vmem>>, vector<128x128xf32>
    tpu.vector_store %arg8[%c0_38, %c0_39], %96 {strides = array<i32>} : memref<128x128xf32, #tpu.memory_space<vmem>>, vector<128x128xf32>,
    return
  }
  func.func @transform_0(%arg0: i32) -> (i32, i32) {
    %c0_i32 = arith.constant 0 : i32
    %c0_i32_0 = arith.constant 0 : i32
    return %arg0, %c0_i32 : i32, i32
  }
  func.func @transform_1(%arg0: i32) -> (i32, i32) {
    %c0_i32 = arith.constant 0 : i32
    %c0_i32_0 = arith.constant 0 : i32
    %c0_i32_1 = arith.constant 0 : i32
    return %c0_i32, %c0_i32_0 : i32, i32
  }
  func.func @transform_2(%arg0: i32) -> (i32, i32) {
    %c0_i32 = arith.constant 0 : i32
    %c0_i32_0 = arith.constant 0 : i32
    %c0_i32_1 = arith.constant 0 : i32
    return %c0_i32, %c0_i32_0 : i32, i32
  }
  func.func @transform_3(%arg0: i32) -> (i32, i32, i32) {
    %c0_i32 = arith.constant 0 : i32
    %c0_i32_0 = arith.constant 0 : i32
    %c0_i32_1 = arith.constant 0 : i32
    %c0_i32_2 = arith.constant 0 : i32
    return %c0_i32, %c0_i32_0, %c0_i32_1 : i32, i32, i32
  }
  func.func @transform_4(%arg0: i32) -> (i32, i32, i32) {
    %c0_i32 = arith.constant 0 : i32
    %c0_i32_0 = arith.constant 0 : i32
    %c0_i32_1 = arith.constant 0 : i32
    %c0_i32_2 = arith.constant 0 : i32
    return %c0_i32, %c0_i32_0, %c0_i32_1 : i32, i32, i32
  }
  func.func @transform_5(%arg0: i32) -> (i32, i32) {
    %c0_i32 = arith.constant 0 : i32
    %c0_i32_0 = arith.constant 0 : i32
    %c0_i32_1 = arith.constant 0 : i32
    return %c0_i32, %c0_i32_0 : i32, i32
  }
  func.func @transform_6(%arg0: i32) -> (i32, i32) {
    %c0_i32 = arith.constant 0 : i32
    %c0_i32_0 = arith.constant 0 : i32
    %c0_i32_1 = arith.constant 0 : i32
    return %c0_i32, %c0_i32_0 : i32, i32
  }
  func.func @transform_7(%arg0: i32) -> (i32, i32) {
    %c0_i32 = arith.constant 0 : i32
    %c0_i32_0 = arith.constant 0 : i32
    return %arg0, %c0_i32 : i32, i32
  }
}

</mosaic_0001>

<bundles_post_ra>
// kernel: tpu_custom_call.1
= control target key start
LH: loop header
LB: loop body
LE: loop exit
PB: predicated region body
PF: predicated region fallthrough
CT: control target
= control target key end

     0   :  { %12 = vsyncpa [#allocation3], 0  ;;  %s4290_s0 = inlined_call_operand.vmem [shape: f32[256,64], index: 0, kind: input, shape index: {}]   ;;  %s4291_s1 = inlined_call_operand.vmem [shape: bf16[64,128], index: 1, kind: input, shape index: {}]   ;;  %s4292_s2 = inlined_call_operand.vmem [shape: f32[1,128], index: 2, kind: input, shape index: {}]   ;;  %s4293_s3 = inlined_call_operand.vmem [shape: bf16[1,128,128], index: 3, kind: input, shape index: {}]   ;;  %s4294_s4 = inlined_call_operand.vmem [shape: f32[1,1,128], index: 4, kind: input, shape index: {}]   ;;  %s4295_s5 = inlined_call_operand.vmem [shape: bf16[128,128], index: 5, kind: input, shape index: {}]   ;;  %s4296_s6 = inlined_call_operand.vmem [shape: f32[1,128], index: 6, kind: input, shape index: {}]   ;;  %s4297_s7 = inlined_call_operand.hbm [shape: f32[256,128], index: 7, kind: output, shape index: {}]  }
   0x1   :  { %14 = vsyncpa [#allocation3 + $0x1], 0  ;;  %s2826_s24 = smov 0   ;;  %s2828_s25 = smov 0  }
   0x2   :  { %s2830_s26 = smov 0   ;;  %s2832_s27 = smov 0  }
   0x3 LB: > { %s2847_s28 = sadd.s32 4294967295, %s2781_s27   ;;  %s2049_s29 = sadd.s32 4294967294, %s2781_s27   ;;  %s2781_s27 = sphi %s2832_s27, %s4416_s27   ;;  %s2777_s26 = sphi %s2830_s26, %s4415_s26   ;;  %s2773_s25 = sphi %s2828_s25, %s4414_s25   ;;  %s2769_s24 = sphi %s2826_s24, %s4413_s24  }
   0x4   : > { %s2851_s30 = sadd.s32 1, %s2781_s27   ;;  %s179_s8 = sadd.s32 1, %s2777_s26 }
   0x5   : > { %s176_s9 = ssub.s32 %s2781_s27, %s2851_s30  ;;  %p189_p0 = scmp.ne.s32.totalorder %s2777_s26, %s2773_s25 }
   0x6   : > { %p177_p1 = scmp.eq.s32.totalorder %s176_s9, 0  ;;  %p190_p2 = scmp.eq.s32.totalorder %s2847_s28, 1 }
   0x7   : > { %p195_p3 = scmp.ne.s32.totalorder %s2773_s25, %s2769_s24  ;;  %p196_p4 = scmp.eq.s32.totalorder %s2049_s29, 1 }
   0x8   : > { %s2862_s10 = scalar_select %p177_p1, %s2777_s26, %s179_s8  }
   0x9   : > { %p2864_p5 = por %p190_p2, %p189_p0  ;;  %p2868_p6 = por %p196_p4, %p195_p3 }
   0xa   : > { %p2052_p7 = scmp.ge.s32.totalorder %s2781_s27, 1  ;;  %p241_p8 = scmp.lt.s32.totalorder %s2781_s27, 3 }
   0xc   : > { %p242_p9 = pnand %p2052_p7, %p241_p8 }
   0xe   : > { %245 = sbr.rel (%p242_p9) target bundleno = 1158 (0x486), region = 48 }
  0x15   : > { %v2282_v0 = vld [vmem:[%s4291_s1] sm:$0xff]   ;;  %s2054_s15 = sshll.u32 %s2847_s28, 4  ;;  %v2283_v1 = vld [vmem:[%s4291_s1 + $0x8] sm:$0xff]   ;;  %v2284_v2 = vld [vmem:[%s4291_s1 + $0x10] sm:$0xff]   ;;  %vm344_vm0 = vcmask 523264   ;;  %s270_s29 = sand.u32 1, %s2773_s25  }
  0x16   : > { %p274_p10 = scmp.lt.s32.totalorder %s2054_s15, 31  ;;  %2137 = vmatprep.subr.bf16.mxu0 %v2282_v0  ;;  %v2286_v3 = vld [vmem:[%s4293_s3] sm:$0xff]   ;;  %v2287_v4 = vld [vmem:[%s4293_s3 + $0x8] sm:$0xff]   ;;  %v2285_v7 = vld [vmem:[%s4291_s1 + $0x18] sm:$0xff]   ;;  %s4018_s8 = sshll.u32 %s270_s29, 7 }
  0x17   : > { %2138 = vmatpush3.bf16.msra.mxu0 %v2282_v0  ;;  %2161 = vmatprep.subr.bf16.mxu1 %v2286_v3  ;;  %v2288_v9 = vld [vmem:[%s4293_s3 + $0x10] sm:$0xff]   ;;  %v2289_v14 = vld [vmem:[%s4293_s3 + $0x18] sm:$0xff]   ;;  %v2290_v17 = vld [vmem:[%s4293_s3 + $0x20] sm:$0xff]   ;;  %s4046_s9 = scalar_lea.vmem [#allocation2], %s4018_s8  ;;  %s2092_s14 = sshll.u32 %s2847_s28, 11 }
  0x18   : > { %s4418_s15 = smov (!%p274_p10, %s2054_s15), 31  ;;  %2139 = vmatprep.subr.bf16.mxu0 %v2283_v1  ;;  %2162 = vmatpush3.bf16.msra.mxu1 %v2286_v3  ;;  %v2291_v22 = vld [vmem:[%s4293_s3 + $0x28] sm:$0xff]   ;;  %v2292_v34 = vld [vmem:[%s4293_s3 + $0x30] sm:$0xff]   ;;  %v2293_v35 = vld [vmem:[%s4293_s3 + $0x38] sm:$0xff]   ;;  %s4239_s17 = scalar_lea.hbm %s4297_s7, %s2092_s14 }
  0x19   : > { %s2055_s22 = sshll.u32 %s4418_s15, 3  ;;  %2163 = vmatprep.subr.bf16.mxu1 %v2287_v4  ;;  %v2294_v36 = vld [vmem:[%s4295_s5] sm:$0xff]   ;;  %v2295_v37 = vld [vmem:[%s4295_s5 + $0x8] sm:$0xff]   ;;  %v2296_v38 = vld [vmem:[%s4295_s5 + $0x10] sm:$0xff]   ;;  %s1987_s15 = sshll.u32 %s4046_s9, 4  ;;  %s4241_s15 = int_to_ptr.vmem [resolvable:$true] %s1987_s15 }
  0x1a   : > { %s2893_s13 = scalar_lea.vmem %s4290_s0, %s2055_s22  ;;  %v2952_v39 = vld [vmem:[%s4295_s5 + $0x18] sm:$0xff]   ;;  %v2958_v40 = vld [vmem:[%s4295_s5 + $0x20] sm:$0xff]   ;;  %v2965_v41 = vld [vmem:[%s4295_s5 + $0x28] sm:$0xff]   ;;  %s4249_s28 = scalar_lea.sflag [#allocation3], %s270_s29 }
  0x1b   : > { %2140 = vmatpush3.bf16.msra.mxu0 %v2283_v1  ;;  %v281_v5 = vld [vmem:[%s2893_s13] sm:$0xff]  ;;  %v282_v6 = vld [vmem:[%s2893_s13 + $0x8] sm:$0xff]  ;;  %v283_v10 = vld [vmem:[%s2893_s13 + $0x10] sm:$0xff]  ;;  %s2719_s18 = scalar_lea.vmem %s4241_s15, 2048  ;;  %s2783_s19 = smov [#allocation2]  }
  0x1c   : > { %2141 = vmatprep.subr.bf16.mxu0 %v2284_v2  ;;  %v297_v8 = vpack.c.bf16 %v282_v6, %v281_v5  ;;  %v284_v11 = vld [vmem:[%s2893_s13 + $0x18] sm:$0xff]  ;;  %v285_v12 = vld [vmem:[%s2893_s13 + $0x20] sm:$0xff]  ;;  %2164 = vmatpush3.bf16.msra.mxu1 %v2287_v4  ;;  %v286_v13 = vld [vmem:[%s2893_s13 + $0x28] sm:$0xff]  ;;  %p2720_p11 = scmp.ne.s32.totalorder %s4241_s15, %s2719_s18  ;;  %s2723_s20 = sshll.u32 %s2783_s19, 4  ;;  %s2724_s20 = int_to_ptr.vmem [resolvable:$false] %s2723_s20 }
  0x1d   : > { %2165 = vmatprep.subr.bf16.mxu1 %v2288_v9  ;;  %v298_v15 = vpack.c.bf16 %v284_v11, %v283_v10  ;;  %v299_v16 = vpack.c.bf16 %v286_v13, %v285_v12  ;;  %v287_v18 = vld [vmem:[%s2893_s13 + $0x30] sm:$0xff]  ;;  %v288_v19 = vld [vmem:[%s2893_s13 + $0x38] sm:$0xff]  ;;  %v289_v20 = vld [vmem:[%s2893_s13 + $0x40] sm:$0xff]  ;;  %s2725_s21 = scalar_lea.vmem %s2724_s20, 4096  ;;  %p2726_p0 = scmp.lt.s32.totalorder %s4241_s15, %s2724_s20 }
  0x1e   : > { %2145 = vmatprep.mubr.msk.bf16.mxu0 %vm344_vm0, %v297_v8  ;;  %v290_v21 = vld [vmem:[%s2893_s13 + $0x48] sm:$0xff]  ;;  %v300_v23 = vpack.c.bf16 %v288_v19, %v287_v18  ;;  %v291_v25 = vld [vmem:[%s2893_s13 + $0x50] sm:$0xff]  ;;  %v292_v26 = vld [vmem:[%s2893_s13 + $0x58] sm:$0xff]  ;;  %p2721_p12 = pnand %p2720_p11, %p2864_p5  ;;  %p2727_p1 = scmp.lt.s32.totalorder %s2725_s21, %s2719_s18 }
  0x1f   : > { %2142 = vmatpush3.bf16.msra.mxu0 %v2284_v2  ;;  %v301_v24 = vpack.c.bf16 %v290_v21, %v289_v20  ;;  %v293_v27 = vld [vmem:[%s2893_s13 + $0x60] sm:$0xff]  ;;  %v294_v28 = vld [vmem:[%s2893_s13 + $0x68] sm:$0xff]  ;;  %v302_v29 = vpack.c.bf16 %v292_v26, %v291_v25  ;;  %v295_v31 = vld [vmem:[%s2893_s13 + $0x70] sm:$0xff] }
  0x20   : > { %2143 = vmatprep.subr.bf16.mxu0 %v2285_v7  ;;  %2166 = vmatpush3.bf16.msra.mxu1 %v2288_v9  ;;  %v303_v30 = vpack.c.bf16 %v294_v28, %v293_v27  ;;  %v296_v32 = vld [vmem:[%s2893_s13 + $0x78] sm:$0xff]  ;;  %v2973_v42 = vld [vmem:[%s4292_s2] ss:$0 sm:$0xff]  ;;  %p2722_p13 = pneg %p2721_p12  ;;  %p2728_p2 = por %p2727_p1, %p2726_p0 }
  0x21   : > { %2167 = vmatprep.subr.bf16.mxu1 %v2289_v14  ;;  %v304_v33 = vpack.c.bf16 %v296_v32, %v295_v31 }
  0x22   : > { %p2729_p3 = pnand %p2728_p2, %p2722_p13 }
  0x23   : > { %2144 = vmatpush3.bf16.msra.mxu0 %v2285_v7 }
  0x24   : > { %2168 = vmatpush3.bf16.msra.mxu1 %v2289_v14  ;;  %2193 = vmatprep.subr.bf16.mxu0 %v2294_v36 }
  0x25   : > { %2169 = vmatprep.subr.bf16.mxu1 %v2290_v17 }
  0x26   : > { %2146 = vmatmul.mubr.msk.bf16.vlgmr.msra.gmra.mrb[0].mxu0 %vm344_vm0, %v298_v15 }
  0x27   : > { %2149 = vmatprep.mubr.msk.bf16.mxu0 %vm344_vm0, %v299_v16  ;;  %2194 = vmatpush3.bf16.msra.mxu0 %v2294_v36 }
  0x28   : > { %2170 = vmatpush3.bf16.msra.mxu1 %v2290_v17  ;;  %2195 = vmatprep.subr.bf16.mxu0 %v2295_v37 }
  0x29   : > { %2171 = vmatprep.subr.bf16.mxu1 %v2291_v22 }
  0x2b   : > { %2196 = vmatpush3.bf16.msra.mxu0 %v2295_v37 }
  0x2c   : > { %2172 = vmatpush3.bf16.msra.mxu1 %v2291_v22  ;;  %2197 = vmatprep.subr.bf16.mxu0 %v2296_v38 }
  0x2d   : > { %2173 = vmatprep.subr.bf16.mxu1 %v2292_v34 }
  0x2e   : > { %2150 = vmatmul.mubr.msk.bf16.gmra.mrb[4].mxu0 %vm344_vm0, %v300_v23 }
  0x2f   : > { %2153 = vmatprep.mubr.msk.bf16.mxu0 %vm344_vm0, %v301_v24  ;;  %2198 = vmatpush3.bf16.msra.mxu0 %v2296_v38 }
  0x30   : > { %2174 = vmatpush3.bf16.msra.mxu1 %v2292_v34  ;;  %2199 = vmatprep.subr.bf16.mxu0 %v2952_v39 }
  0x31   : > { %2175 = vmatprep.subr.bf16.mxu1 %v2293_v35 }
  0x33   : > { %2200 = vmatpush3.bf16.msra.mxu0 %v2952_v39 }
  0x34   : > { %2176 = vmatpush3.bf16.msra.mxu1 %v2293_v35  ;;  %2201 = vmatprep.subr.bf16.mxu0 %v2958_v40  ;;  %v2300_v35 = vld [vmem:[%s4295_s5 + $0x30] sm:$0xff]  }
  0x35   : > { %2225 = vmatprep.subr.bf16.mxu1 %v2294_v36 }
  0x36   : > { %2154 = vmatmul.mubr.msk.bf16.gmra.mrb[8].mxu0 %vm344_vm0, %v302_v29 }
  0x37   : > { %2157 = vmatprep.mubr.msk.bf16.mxu0 %vm344_vm0, %v303_v30  ;;  %2202 = vmatpush3.bf16.msra.mxu0 %v2958_v40 }
  0x38   : > { %2203 = vmatprep.subr.bf16.mxu0 %v2965_v41 }
  0x3b   : > { %2204 = vmatpush3.bf16.msra.mxu0 %v2965_v41 }
  0x3c   : > { %2205 = vmatprep.subr.bf16.mxu0 %v2300_v35 }
  0x3e   : > { %2158 = vmatmul.mubr.msk.bf16.gmra.mrb[12].mxu0 %vm344_vm0, %v304_v33 }
  0x3f   : > { %2206 = vmatpush3.bf16.msra.mxu0 %v2300_v35 }
  0xf9   : > { %v2147_v43 = vpop.f32.mrb[0].mxu0 }
  0xfa   : > { %v412_v44 = vadd.f32 %v2147_v43, %v2973_v42  ;;  %v403_v45 = vpop.f32.mrb[1].mxu0 }
  0xfb   : > { %v404_v46 = vadd.f32 %v2973_v42, %v403_v45  ;;  %v2148_v47 = vpop.f32.mrb[2].mxu0 }
  0xfc   : > { %v415_v48 = vadd.f32 %v2148_v47, %v2973_v42  ;;  %v406_v49 = vpop.f32.mrb[3].mxu0  ;;  %v468_v51 = vmax.f32 %v412_v44, 0.0 }
  0xfd   : > { %v407_v50 = vadd.f32 %v2973_v42, %v406_v49  ;;  %v466_v53 = vmax.f32 %v404_v46, 0.0 }
  0xfe   : > { %v469_v52 = vmax.f32 %v415_v48, 0.0 }
  0xff   : > { %v467_v54 = vmax.f32 %v407_v50, 0.0 }
 0x100   : > { %v483_v55 = vpack.c.bf16 %v469_v52, %v468_v51 }
 0x101   : > { %v2151_v56 = vpop.f32.mrb[4].mxu0  ;;  %v482_v57 = vpack.c.bf16 %v467_v54, %v466_v53 }
 0x102   : > { %v428_v58 = vadd.f32 %v2151_v56, %v2973_v42  ;;  %v419_v59 = vpop.f32.mrb[5].mxu0 }
 0x103   : > { %v420_v60 = vadd.f32 %v2973_v42, %v419_v59  ;;  %v2152_v61 = vpop.f32.mrb[6].mxu0  ;;  %2177 = vmatprep.mubr.bf16.mxu1 %v482_v57 }
 0x104   : > { %v431_v62 = vadd.f32 %v2152_v61, %v2973_v42  ;;  %v422_v63 = vpop.f32.mrb[7].mxu0  ;;  %2178 = vmatmul.mubr.bf16.vlgmr.msra.gmra.mrb[0].mxu1 %v483_v55  ;;  %v472_v1 = vmax.f32 %v428_v58, 0.0 }
 0x105   : > { %v423_v0 = vadd.f32 %v2973_v42, %v422_v63  ;;  %2233 = vmatpush3.bf16.msra.mxu1 %v2294_v36  ;;  %v470_v3 = vmax.f32 %v420_v60, 0.0  ;;  %v2301_v36 = vld [vmem:[%s4295_s5 + $0x38] sm:$0xff]  }
 0x106   : > { %v473_v2 = vmax.f32 %v431_v62, 0.0  ;;  %2226 = vmatprep.subr.bf16.mxu1 %v2295_v37  ;;  %2207 = vmatprep.subr.bf16.mxu0 %v2301_v36 }
 0x107   : > { %v471_v4 = vmax.f32 %v423_v0, 0.0  ;;  %2208 = vmatpush3.bf16.msra.mxu0 %v2301_v36 }
 0x108   : > { %v485_v5 = vpack.c.bf16 %v473_v2, %v472_v1 }
 0x109   : > { %v484_v6 = vpack.c.bf16 %v471_v4, %v470_v3  ;;  %v2155_v7 = vpop.f32.mrb[8].mxu0  ;;  %2234 = vmatpush3.bf16.msra.mxu1 %v2295_v37  ;;  %v3006_v37 = vld [vmem:[%s4294_s4] ss:$0 sm:$0xff] }
 0x10a   : > { %v444_v8 = vadd.f32 %v2155_v7, %v2973_v42  ;;  %v435_v9 = vpop.f32.mrb[9].mxu0  ;;  %2227 = vmatprep.subr.bf16.mxu1 %v2296_v38 }
 0x10b   : > { %v436_v10 = vadd.f32 %v2973_v42, %v435_v9  ;;  %v2156_v11 = vpop.f32.mrb[10].mxu0  ;;  %2181 = vmatprep.mubr.bf16.mxu1 %v484_v6 }
 0x10c   : > { %v447_v12 = vadd.f32 %v2156_v11, %v2973_v42  ;;  %v438_v13 = vpop.f32.mrb[11].mxu0  ;;  %2182 = vmatmul.mubr.bf16.gmra.mrb[4].mxu1 %v485_v5  ;;  %v476_v15 = vmax.f32 %v444_v8, 0.0 }
 0x10d   : > { %v439_v14 = vadd.f32 %v2973_v42, %v438_v13  ;;  %2235 = vmatpush3.bf16.msra.mxu1 %v2296_v38  ;;  %v474_v17 = vmax.f32 %v436_v10, 0.0 }
 0x10e   : > { %v477_v16 = vmax.f32 %v447_v12, 0.0  ;;  %2228 = vmatprep.subr.bf16.mxu1 %v2952_v39 }
 0x10f   : > { %v475_v18 = vmax.f32 %v439_v14, 0.0 }
 0x110   : > { %v487_v19 = vpack.c.bf16 %v477_v16, %v476_v15 }
 0x111   : > { %v486_v20 = vpack.c.bf16 %v475_v18, %v474_v17  ;;  %v2159_v21 = vpop.f32.mrb[12].mxu0  ;;  %2236 = vmatpush3.bf16.msra.mxu1 %v2952_v39 }
 0x112   : > { %v460_v22 = vadd.f32 %v2159_v21, %v2973_v42  ;;  %v451_v23 = vpop.f32.mrb[13].mxu0  ;;  %2229 = vmatprep.subr.bf16.mxu1 %v2958_v40 }
 0x113   : > { %v452_v24 = vadd.f32 %v2973_v42, %v451_v23  ;;  %v2160_v25 = vpop.f32.mrb[14].mxu0  ;;  %2185 = vmatprep.mubr.bf16.mxu1 %v486_v20 }
 0x114   : > { %v463_v26 = vadd.f32 %v2160_v25, %v2973_v42  ;;  %v454_v27 = vpop.f32.mrb[15].mxu0  ;;  %2186 = vmatmul.mubr.bf16.gmra.mrb[8].mxu1 %v487_v19  ;;  %v480_v29 = vmax.f32 %v460_v22, 0.0 }
 0x115   : > { %v455_v28 = vadd.f32 %v2973_v42, %v454_v27  ;;  %2237 = vmatpush3.bf16.msra.mxu1 %v2958_v40  ;;  %v478_v31 = vmax.f32 %v452_v24, 0.0 }
 0x116   : > { %v481_v30 = vmax.f32 %v463_v26, 0.0  ;;  %2230 = vmatprep.subr.bf16.mxu1 %v2965_v41 }
 0x117   : > { %v479_v32 = vmax.f32 %v455_v28, 0.0 }
 0x118   : > { %v489_v33 = vpack.c.bf16 %v481_v30, %v480_v29 }
 0x119   : > { %v488_v34 = vpack.c.bf16 %v479_v32, %v478_v31  ;;  %2238 = vmatpush3.bf16.msra.mxu1 %v2965_v41 }
 0x11a   : > { %2231 = vmatprep.subr.bf16.mxu1 %v2300_v35 }
 0x11b   : > { %2189 = vmatprep.mubr.bf16.mxu1 %v488_v34 }
 0x11c   : > { %2190 = vmatmul.mubr.bf16.gmra.mrb[12].mxu1 %v489_v33 }
 0x11d   : > { %2239 = vmatpush3.bf16.msra.mxu1 %v2300_v35 }
 0x11e   : > { %2232 = vmatprep.subr.bf16.mxu1 %v2301_v36 }
 0x121   : > { %2240 = vmatpush3.bf16.msra.mxu1 %v2301_v36 }
 0x1d7   : > { %v2179_v38 = vpop.f32.mrb[0].mxu1 }
 0x1d8   : > { %v604_v39 = vadd.f32 %v2179_v38, %v3006_v37  ;;  %v595_v40 = vpop.f32.mrb[1].mxu1 }
 0x1d9   : > { %v596_v41 = vadd.f32 %v3006_v37, %v595_v40  ;;  %v2180_v42 = vpop.f32.mrb[2].mxu1 }
 0x1da   : > { %v660_v43 = vmax.f32 %v604_v39, 0.0  ;;  %v607_v44 = vadd.f32 %v2180_v42, %v3006_v37  ;;  %v598_v45 = vpop.f32.mrb[3].mxu1 }
 0x1db   : > { %v658_v46 = vmax.f32 %v596_v41, 0.0  ;;  %v599_v47 = vadd.f32 %v3006_v37, %v598_v45 }
 0x1dc   : > { %v661_v48 = vmax.f32 %v607_v44, 0.0  ;;  %v864_v49 = vmul.f32 %v660_v43, %v660_v43 }
 0x1dd   : > { %v659_v50 = vmax.f32 %v599_v47, 0.0  ;;  %v862_v51 = vmul.f32 %v658_v46, %v658_v46  ;;  %v843_v47 = vlaneseq }
 0x1de   : > { %v675_v52 = vpack.c.bf16 %v661_v48, %v660_v43  ;;  %882 = vadd.xlane.f32.xlu1 %v864_v49  ;;  %v865_v57 = vmul.f32 %v661_v48, %v661_v48 }
 0x1df   : > { %v674_v53 = vpack.c.bf16 %v659_v50, %v658_v46  ;;  %v2183_v54 = vpop.f32.mrb[4].mxu1  ;;  %878 = vadd.xlane.f32.xlu0 %v862_v51  ;;  %v863_v60 = vmul.f32 %v659_v50, %v659_v50  ;;  %v3024_v48 = vand.u32 127, %v843_v47 }
 0x1e0   : > { %v620_v55 = vadd.f32 %v2183_v54, %v3006_v37  ;;  %v611_v56 = vpop.f32.mrb[5].mxu1 }
 0x1e1   : > { %v612_v58 = vadd.f32 %v3006_v37, %v611_v56  ;;  %v2184_v59 = vpop.f32.mrb[6].mxu1  ;;  %2209 = vmatprep.mubr.bf16.mxu0 %v674_v53  ;;  %4334 = vst [vmem:[#allocation5_spill] sm:$0xff] %v3024_v48  ;;  %vm845_vm1 = vcmp.lt.s32.totalorder %v3024_v48, 16 }
 0x1e2   : > { %v664_v61 = vmax.f32 %v620_v55, 0.0  ;;  %v623_v62 = vadd.f32 %v2184_v59, %v3006_v37  ;;  %884 = vadd.xlane.f32.xlu1 %v865_v57  ;;  %v614_v63 = vpop.f32.mrb[7].mxu1  ;;  %2210 = vmatmul.mubr.bf16.vlgmr.msra.gmra.mrb[16].mxu0 %v675_v52 }
 0x1e3   : > { %v615_v0 = vadd.f32 %v3006_v37, %v614_v63  ;;  %880 = vadd.xlane.f32.xlu0 %v863_v60  ;;  %v662_v3 = vmax.f32 %v612_v58, 0.0 }
 0x1e4   : > { %v665_v1 = vmax.f32 %v623_v62, 0.0  ;;  %v868_v2 = vmul.f32 %v664_v61, %v664_v61 }
 0x1e5   : > { %v663_v4 = vmax.f32 %v615_v0, 0.0  ;;  %v866_v13 = vmul.f32 %v662_v3, %v662_v3 }
 0x1e6   : > { %v677_v5 = vpack.c.bf16 %v665_v1, %v664_v61  ;;  %v869_v6 = vmul.f32 %v665_v1, %v665_v1 }
 0x1e7   : > { %v676_v7 = vpack.c.bf16 %v663_v4, %v662_v3  ;;  %v2187_v8 = vpop.f32.mrb[8].mxu1  ;;  %890 = vadd.xlane.f32.xlu0 %v868_v2  ;;  %v867_v17 = vmul.f32 %v663_v4, %v663_v4 }
 0x1e8   : > { %v636_v9 = vadd.f32 %v2187_v8, %v3006_v37  ;;  %892 = vadd.xlane.f32.xlu1 %v869_v6  ;;  %v627_v10 = vpop.f32.mrb[9].mxu1 }
 0x1e9   : > { %v628_v11 = vadd.f32 %v3006_v37, %v627_v10  ;;  %v2188_v12 = vpop.f32.mrb[10].mxu1  ;;  %2213 = vmatprep.mubr.bf16.mxu0 %v676_v7 }
 0x1ea   : > { %v668_v14 = vmax.f32 %v636_v9, 0.0  ;;  %v639_v15 = vadd.f32 %v2188_v12, %v3006_v37  ;;  %v630_v16 = vpop.f32.mrb[11].mxu1  ;;  %2214 = vmatmul.mubr.bf16.gmra.mrb[20].mxu0 %v677_v5 }
 0x1eb   : > { %v631_v18 = vadd.f32 %v3006_v37, %v630_v16  ;;  %886 = vadd.xlane.f32.xlu0 %v866_v13  ;;  %v666_v21 = vmax.f32 %v628_v11, 0.0 }
 0x1ec   : > { %v669_v19 = vmax.f32 %v639_v15, 0.0  ;;  %888 = vadd.xlane.f32.xlu1 %v867_v17  ;;  %v872_v20 = vmul.f32 %v668_v14, %v668_v14 }
 0x1ed   : > { %v667_v22 = vmax.f32 %v631_v18, 0.0  ;;  %v870_v31 = vmul.f32 %v666_v21, %v666_v21 }
 0x1ee   : > { %v679_v23 = vpack.c.bf16 %v669_v19, %v668_v14  ;;  %v873_v24 = vmul.f32 %v669_v19, %v669_v19 }
 0x1ef   : > { %v678_v25 = vpack.c.bf16 %v667_v22, %v666_v21  ;;  %v2191_v26 = vpop.f32.mrb[12].mxu1  ;;  %898 = vadd.xlane.f32.xlu0 %v872_v20  ;;  %v871_v35 = vmul.f32 %v667_v22, %v667_v22  ;;  %v2086_v20 = vld [vmem:[%s4296_s6] ss:$0 sm:$0xff] }
 0x1f0   : > { %v652_v27 = vadd.f32 %v2191_v26, %v3006_v37  ;;  %v643_v28 = vpop.f32.mrb[13].mxu1  ;;  %900 = vadd.xlane.f32.xlu1 %v873_v24 }
 0x1f1   : > { %v644_v29 = vadd.f32 %v3006_v37, %v643_v28  ;;  %v2192_v30 = vpop.f32.mrb[14].mxu1  ;;  %2217 = vmatprep.mubr.bf16.mxu0 %v678_v25 }
 0x1f2   : > { %v672_v32 = vmax.f32 %v652_v27, 0.0  ;;  %v655_v33 = vadd.f32 %v2192_v30, %v3006_v37  ;;  %v646_v34 = vpop.f32.mrb[15].mxu1  ;;  %2218 = vmatmul.mubr.bf16.gmra.mrb[24].mxu0 %v679_v23 }
 0x1f3   : > { %v647_v36 = vadd.f32 %v3006_v37, %v646_v34  ;;  %894 = vadd.xlane.f32.xlu0 %v870_v31  ;;  %v670_v40 = vmax.f32 %v644_v29, 0.0 }
 0x1f4   : > { %v673_v38 = vmax.f32 %v655_v33, 0.0  ;;  %896 = vadd.xlane.f32.xlu1 %v871_v35  ;;  %v876_v39 = vmul.f32 %v672_v32, %v672_v32 }
 0x1f5   : > { %v671_v41 = vmax.f32 %v647_v36, 0.0  ;;  %v874_v45 = vmul.f32 %v670_v40, %v670_v40 }
 0x1f6   : > { %v681_v42 = vpack.c.bf16 %v673_v38, %v672_v32  ;;  %v877_v43 = vmul.f32 %v673_v38, %v673_v38 }
 0x1f7   : > { %v680_v44 = vpack.c.bf16 %v671_v41, %v670_v40  ;;  %906 = vadd.xlane.f32.xlu0 %v876_v39  ;;  %v875_v46 = vmul.f32 %v671_v41, %v671_v41 }
 0x1f8   : > { %908 = vadd.xlane.f32.xlu1 %v877_v43 }
 0x1f9   : > { %2221 = vmatprep.mubr.bf16.mxu1 %v680_v44 }
 0x1fa   : > { %2222 = vmatmul.mubr.bf16.vlgmr.msra.gmra.mrb[16].mxu1 %v681_v42 }
 0x1fb   : > { %902 = vadd.xlane.f32.xlu0 %v874_v45 }
 0x1fc   : > { %904 = vadd.xlane.f32.xlu1 %v875_v46 }
 0x26b   : > { %v883_v38 = vpop.xlane.xlu1 %882 }
 0x26c   : > { %v879_v35 = vpop.xlane.xlu0 %878  ;;  %2302 = vrsqrt.f32 %v883_v38  ;;  %vm926_vm2 = vcmp.eq.f32.partialorder %v883_v38, inf  ;;  %vm928_vm3 = vcmp.eq.f32.partialorder %v883_v38, 0.0 }
 0x26d   : > { %2304 = vrsqrt.f32 %v879_v35  ;;  %vm912_vm4 = vcmp.eq.f32.partialorder %v879_v35, inf  ;;  %vm914_vm5 = vcmp.eq.f32.partialorder %v879_v35, 0.0 }
 0x26f   : > { %v885_v40 = vpop.xlane.xlu1 %884 }
 0x270   : > { %v881_v39 = vpop.xlane.xlu0 %880  ;;  %2306 = vrsqrt.f32 %v885_v40  ;;  %vm933_vm6 = vcmp.eq.f32.partialorder %v885_v40, inf  ;;  %vm935_vm8 = vcmp.eq.f32.partialorder %v885_v40, 0.0 }
 0x271   : > { %2308 = vrsqrt.f32 %v881_v39  ;;  %vm919_vm7 = vcmp.eq.f32.partialorder %v881_v39, inf  ;;  %vm921_vm9 = vcmp.eq.f32.partialorder %v881_v39, 0.0 }
 0x274   : > { %v3171_v41 = vpop.xlane.xlu0 %890 }
 0x275   : > { %v3173_v42 = vpop.xlane.xlu1 %892  ;;  %2310 = vrsqrt.f32 %v3171_v41  ;;  %vm954_vm10 = vcmp.eq.f32.partialorder %v3171_v41, inf  ;;  %vm956_vm11 = vcmp.eq.f32.partialorder %v3171_v41, 0.0 }
 0x276   : > { %v2303_v43 = vpop.eup %2302  ;;  %2312 = vrsqrt.f32 %v3173_v42  ;;  %vm961_vm12 = vcmp.eq.f32.partialorder %v3173_v42, inf  ;;  %vm963_vm13 = vcmp.eq.f32.partialorder %v3173_v42, 0.0 }
 0x277   : > { %v925_v44 = vmul.f32 %v2303_v43, %v883_v38  ;;  %v2305_v47 = vpop.eup %2304  ;;  %v936_v43 = vand.u32 2147483648, %v885_v40 }
 0x278   : > { %v3175_v45 = vpop.xlane.xlu0 %886 }
 0x279   : > { %v3177_v46 = vpop.xlane.xlu1 %888  ;;  %2314 = vrsqrt.f32 %v3175_v45  ;;  %vm940_vm14 = vcmp.eq.f32.partialorder %v3175_v45, inf  ;;  %vm942_vm0 = vcmp.eq.f32.partialorder %v3175_v45, 0.0 }
 0x27a   : > { %2316 = vrsqrt.f32 %v3177_v46  ;;  %vm947_vm15 = vcmp.eq.f32.partialorder %v3177_v46, inf }
 0x2b5   : > { %v3027_v37 = vpop.f32.mrb[16].mxu0 }
 0x2b6   : > { %4335 = vst [vmem:[#allocation6_spill] sm:$0xff] %v3027_v37  ;;  %v3032_v49 = vsel %vm845_vm1, %v3027_v37, 0.0  ;;  %v3034_v50 = vpop.f32.mrb[17].mxu0 }
 0x2b7   : > { %4336 = vst [vmem:[#allocation7_spill] sm:$0xff] %v3034_v50  ;;  %v3036_v51 = vpop.f32.mrb[18].mxu0  ;;  %v1040_v52 = vmul.f32 %v3032_v49, %v3032_v49  ;;  %v3050_v55 = vsel %vm845_vm1, %v3034_v50, 0.0 }
 0x2b8   : > { %4337 = vst [vmem:[#allocation8_spill] sm:$0xff] %v3036_v51  ;;  %v3040_v53 = vpop.f32.mrb[19].mxu0  ;;  %v3045_v54 = vsel %vm845_vm1, %v3036_v51, 0.0  ;;  %v1038_v59 = vmul.f32 %v3050_v55, %v3050_v55 }
 0x2b9   : > { %4338 = vst [vmem:[#allocation9_spill] sm:$0xff] %v3040_v53  ;;  %1058 = vadd.xlane.f32.xlu0 %v1040_v52  ;;  %v1041_v56 = vmul.f32 %v3045_v54, %v3045_v54  ;;  %v3059_v58 = vsel %vm845_vm1, %v3040_v53, 0.0  ;;  %v927_v52 = vsel %vm926_vm2, %v883_v38, %v925_v44  ;;  %vm949_vm2 = vcmp.eq.f32.partialorder %v3177_v46, 0.0 }
 0x2ba   : > { %v1039_v0 = vmul.f32 %v3059_v58, %v3059_v58 }
 0x2bb   : > { %1060 = vadd.xlane.f32.xlu1 %v1041_v56  ;;  %v929_v56 = vand.u32 2147483648, %v883_v38 }
 0x2bd   : > { %v3054_v57 = vpop.f32.mrb[20].mxu0  ;;  %1054 = vadd.xlane.f32.xlu0 %v1038_v59  ;;  %v3180_v59 = vpop.xlane.xlu0 %898 }
 0x2be   : > { %4339 = vst [vmem:[#allocation10_spill] sm:$0xff] %v3054_v57  ;;  %v3063_v60 = vpop.f32.mrb[21].mxu0  ;;  %v3072_v63 = vsel %vm845_vm1, %v3054_v57, 0.0 }
 0x2bf   : > { %4340 = vst [vmem:[#allocation11_spill] sm:$0xff] %v3063_v60  ;;  %v3065_v61 = vpop.f32.mrb[22].mxu0  ;;  %1056 = vadd.xlane.f32.xlu1 %v1039_v0  ;;  %v1044_v2 = vmul.f32 %v3072_v63, %v3072_v63  ;;  %v3086_v3 = vsel %vm845_vm1, %v3063_v60, 0.0  ;;  %v930_v0 = vsel %vm928_vm3, %v929_v56, %v927_v52  ;;  %v922_v52 = vand.u32 2147483648, %v881_v39 }
 0x2c0   : > { %4341 = vst [vmem:[#allocation12_spill] sm:$0xff] %v3065_v61  ;;  %v3067_v62 = vpop.f32.mrb[23].mxu0  ;;  %v3079_v1 = vsel %vm845_vm1, %v3065_v61, 0.0  ;;  %v1042_v9 = vmul.f32 %v3086_v3, %v3086_v3  ;;  %vm982_vm3 = vcmp.eq.f32.partialorder %v3180_v59, inf }
 0x2c1   : > { %4342 = vst [vmem:[#allocation13_spill] sm:$0xff] %v3067_v62  ;;  %1066 = vadd.xlane.f32.xlu0 %v1044_v2  ;;  %v1045_v6 = vmul.f32 %v3079_v1, %v3079_v1  ;;  %v3099_v8 = vsel %vm845_vm1, %v3067_v62, 0.0  ;;  %v911_v2 = vmul.f32 %v2305_v47, %v879_v35 }
 0x2c2   : > { %v1043_v11 = vmul.f32 %v3099_v8, %v3099_v8 }
 0x2c3   : > { %1068 = vadd.xlane.f32.xlu1 %v1045_v6  ;;  %v3182_v6 = vpop.xlane.xlu1 %900 }
 0x2c5   : > { %v3088_v4 = vpop.f32.mrb[24].mxu0  ;;  %1062 = vadd.xlane.f32.xlu0 %v1042_v9  ;;  %v2307_v9 = vpop.eup %2306 }
 0x2c6   : > { %4343 = vst [vmem:[#allocation14_spill] sm:$0xff] %v3088_v4  ;;  %v3090_v5 = vpop.f32.mrb[25].mxu0  ;;  %v3110_v12 = vsel %vm845_vm1, %v3088_v4, 0.0 }
 0x2c7   : > { %4344 = vst [vmem:[#allocation15_spill] sm:$0xff] %v3090_v5  ;;  %v3094_v7 = vpop.f32.mrb[26].mxu0  ;;  %1064 = vadd.xlane.f32.xlu1 %v1043_v11  ;;  %v1048_v17 = vmul.f32 %v3110_v12, %v3110_v12  ;;  %v3129_v21 = vsel %vm845_vm1, %v3090_v5, 0.0  ;;  %v2309_v11 = vpop.eup %2308 }
 0x2c8   : > { %4345 = vst [vmem:[#allocation16_spill] sm:$0xff] %v3094_v7  ;;  %v3103_v10 = vpop.f32.mrb[27].mxu0  ;;  %v3115_v13 = vsel %vm845_vm1, %v3094_v7, 0.0  ;;  %v1046_v23 = vmul.f32 %v3129_v21, %v3129_v21 }
 0x2c9   : > { %4346 = vst [vmem:[#allocation17_spill] sm:$0xff] %v3103_v10  ;;  %v1049_v18 = vmul.f32 %v3115_v13, %v3115_v13  ;;  %1074 = vadd.xlane.f32.xlu0 %v1048_v17  ;;  %v3138_v24 = vsel %vm845_vm1, %v3103_v10, 0.0  ;;  %v915_v17 = vand.u32 2147483648, %v879_v35 }
 0x2ca   : > { %4349 = vst [vmem:[#allocation20_spill] sm:$0xff] %v3138_v24  ;;  %v1047_v26 = vmul.f32 %v3138_v24, %v3138_v24 }
 0x2cb   : > { %1076 = vadd.xlane.f32.xlu1 %v1049_v18  ;;  %v932_v18 = vmul.f32 %v2307_v9, %v885_v40 }
 0x2cd   : > { %v2223_v14 = vpop.f32.mrb[16].mxu1  ;;  %1070 = vadd.xlane.f32.xlu0 %v1046_v23  ;;  %v918_v23 = vmul.f32 %v2309_v11, %v881_v39 }
 0x2ce   : > { %v3117_v15 = vpop.f32.mrb[17].mxu1  ;;  %v3131_v22 = vadd.f32 %v2223_v14, %v2086_v20  ;;  %v3159_v31 = vsel %vm845_vm1, %v2223_v14, 0.0  ;;  %v1024_v14 = vmax.f32 %v930_v0, 1e-15 }
 0x2cf   : > { %4347 = vst [vmem:[#allocation18_spill] sm:$0xff] %v3117_v15  ;;  %v2224_v16 = vpop.f32.mrb[18].mxu1  ;;  %v3147_v27 = vsel %vm845_vm1, %v3117_v15, 0.0  ;;  %1072 = vadd.xlane.f32.xlu1 %v1047_v26  ;;  %4354 = vst [vmem:[#allocation25_spill] sm:$0xff] %v3159_v31  ;;  %v1052_v34 = vmul.f32 %v3159_v31, %v3159_v31  ;;  %v3189_v26 = vpop.xlane.xlu1 %896  ;;  %v920_v44 = vsel %vm919_vm7, %v881_v39, %v918_v23 }
 0x2d0   : > { %v831_v19 = vpop.f32.mrb[19].mxu1  ;;  %4348 = vst [vmem:[#allocation19_spill] sm:$0xff] %v3131_v22  ;;  %v3140_v25 = vadd.f32 %v2224_v16, %v2086_v20  ;;  %4351 = vst [vmem:[#allocation22_spill] sm:$0xff] %v3147_v27  ;;  %v1050_v30 = vmul.f32 %v3147_v27, %v3147_v27  ;;  %v3165_v33 = vsel %vm845_vm1, %v2224_v16, 0.0  ;;  %v913_v16 = vsel %vm912_vm4, %v879_v35, %v911_v2 }
 0x2d1   : > { %v3149_v28 = vadd.f32 %v2086_v20, %v831_v19  ;;  %v3153_v29 = vsel %vm845_vm1, %v831_v19, 0.0  ;;  %4355 = vst [vmem:[#allocation26_spill] sm:$0xff] %v3165_v33  ;;  %v1053_v36 = vmul.f32 %v3165_v33, %v3165_v33  ;;  %v3187_v19 = vpop.xlane.xlu0 %894  ;;  %v2311_v20 = vpop.eup %2310  ;;  %2318 = vrcp.f32 %v1024_v14 }
 0x2d2   : > { %4350 = vst [vmem:[#allocation21_spill] sm:$0xff] %v3140_v25  ;;  %4353 = vst [vmem:[#allocation24_spill] sm:$0xff] %v3153_v29  ;;  %v1051_v32 = vmul.f32 %v3153_v29, %v3153_v29  ;;  %1078 = vadd.xlane.f32.xlu0 %v1050_v30  ;;  %v3191_v30 = vmin.f32 %v1024_v14, 0.99999  ;;  %v2313_v2 = vpop.eup %2312  ;;  %v923_v9 = vsel %vm921_vm9, %v922_v52, %v920_v44  ;;  %vm984_vm4 = vcmp.eq.f32.partialorder %v3180_v59, 0.0 }
 0x2d3   : > { %4352 = vst [vmem:[#allocation23_spill] sm:$0xff] %v3149_v28  ;;  %v3198_v0 = vpop.xlane.xlu1 %908  ;;  %v1023_v39 = vmax.f32 %v923_v9, 1e-15  ;;  %vm968_vm7 = vcmp.eq.f32.partialorder %v3187_v19, inf  ;;  %vm975_vm9 = vcmp.eq.f32.partialorder %v3189_v26, inf  ;;  %v978_v5 = vand.u32 2147483648, %v3189_v26 }
 0x2d4   : > { %1080 = vadd.xlane.f32.xlu1 %v1051_v32  ;;  %v916_v32 = vsel %vm914_vm5, %v915_v17, %v913_v16  ;;  %v1248_v47 = vsub.f32 1.0, %v3191_v30  ;;  %v2315_v16 = vpop.eup %2314  ;;  %v957_v17 = vand.u32 2147483648, %v3171_v41  ;;  %vm989_vm5 = vcmp.eq.f32.partialorder %v3182_v6, inf }
 0x2d5   : > { %v1022_v38 = vmax.f32 %v916_v32, 1e-15  ;;  %v3195_v56 = vpop.xlane.xlu0 %906  ;;  %v960_v32 = vmul.f32 %v2313_v2, %v3173_v42  ;;  %v943_v2 = vand.u32 2147483648, %v3175_v45 }
 0x2d6   : > { %1082 = vadd.xlane.f32.xlu0 %v1052_v34  ;;  %v934_v34 = vsel %vm933_vm6, %v885_v40, %v932_v18  ;;  %v2317_v18 = vpop.eup %2316  ;;  %vm991_vm6 = vcmp.eq.f32.partialorder %v3182_v6, 0.0 }
 0x2d7   : > { %v937_v35 = vsel %vm935_vm8, %v936_v43, %v934_v34  ;;  %2320 = vrcp.f32 %v1022_v38  ;;  %v3202_v40 = vmin.f32 %v1022_v38, 0.99999  ;;  %v939_v34 = vmul.f32 %v2315_v16, %v3175_v45 }
 0x2d8   : > { %1084 = vadd.xlane.f32.xlu1 %v1053_v36  ;;  %v953_v36 = vmul.f32 %v2311_v20, %v3171_v41  ;;  %2322 = vrcp.f32 %v1248_v47  ;;  %v1025_v20 = vmax.f32 %v937_v35, 1e-15  ;;  %v3221_v47 = vmin.f32 %v1023_v39, 0.99999 }
 0x2d9   : > { %2324 = vrsqrt.f32 %v3180_v59  ;;  %v3209_v14 = vpop.xlane.xlu0 %902  ;;  %v1246_v38 = vsub.f32 1.0, %v3202_v40  ;;  %v962_v52 = vsel %vm961_vm12, %v3173_v42, %v960_v32  ;;  %v964_v35 = vand.u32 2147483648, %v3173_v42 }
 0x2da   : > { %v955_v11 = vsel %vm954_vm10, %v3171_v41, %v953_v36  ;;  %2326 = vrsqrt.f32 %v3182_v6  ;;  %v946_v36 = vmul.f32 %v2317_v18, %v3177_v46  ;;  %v3215_v41 = vpop.xlane.xlu1 %904  ;;  %v3218_v43 = vmin.f32 %v1025_v20, 0.99999 }
 0x2db   : > { %v958_v23 = vsel %vm956_vm11, %v957_v17, %v955_v11  ;;  %2328 = vrsqrt.f32 %v3187_v19  ;;  %v941_v9 = vsel %vm940_vm14, %v3175_v45, %v939_v34  ;;  %v950_v16 = vand.u32 2147483648, %v3177_v46  ;;  %v3234_v17 = vpop.eup %2318 }
 0x2dc   : > { %v1028_v44 = vmax.f32 %v958_v23, 1e-15  ;;  %2330 = vrsqrt.f32 %v3189_v26  ;;  %v948_v11 = vsel %vm947_vm15, %v3177_v46, %v946_v36  ;;  %v1249_v18 = vsub.f32 1.0, %v3218_v43 }
 0x2dd   : > { %2332 = vrsqrt.f32 %v3209_v14  ;;  %v965_v32 = vsel %vm963_vm13, %v964_v35, %v962_v52  ;;  %v1247_v34 = vsub.f32 1.0, %v3221_v47  ;;  %v3251_v28 = vsel %vm949_vm2, %v950_v16, %v948_v11 }
 0x2de   : > { %2334 = vrsqrt.f32 %v3215_v41  ;;  %v3237_v23 = vmin.f32 %v1028_v44, 0.99999  ;;  %v1029_v42 = vmax.f32 %v965_v32, 1e-15  ;;  %v3256_v46 = vadd.f32 1.0, %v3191_v30 }
 0x2df   : > { %2336 = vrsqrt.f32 %v3195_v56  ;;  %v985_v11 = vand.u32 2147483648, %v3180_v59  ;;  %v4356_v22 = vmax.f32 %v3251_v28, 1e-15  ;;  %vm970_vm8 = vcmp.eq.f32.partialorder %v3187_v19, 0.0 }
 0x2e0   : > { %2338 = vrcp.f32 %v1246_v38  ;;  %v3249_v38 = vsel %vm942_vm0, %v943_v2, %v941_v9  ;;  %v1252_v35 = vsub.f32 1.0, %v3237_v23  ;;  %vm977_vm10 = vcmp.eq.f32.partialorder %v3189_v26, 0.0 }
 0x2e1   : > { %v3241_v48 = vpop.eup %2320  ;;  %2340 = vrsqrt.f32 %v3198_v0  ;;  %vm1010_vm11 = vcmp.eq.f32.partialorder %v3195_v56, inf  ;;  %vm996_vm12 = vcmp.eq.f32.partialorder %v3209_v14, inf  ;;  %vm1003_vm13 = vcmp.eq.f32.partialorder %v3215_v41, inf }
 0x2e2   : > { %v3247_v36 = vpop.eup %2322  ;;  %2342 = vrcp.f32 %v1025_v20  ;;  %v4304_v20 = vmax.f32 %v3249_v38, 1e-15  ;;  %vm998_vm14 = vcmp.eq.f32.partialorder %v3209_v14, 0.0  ;;  %vm1017_vm15 = vcmp.eq.f32.partialorder %v3198_v0, inf }
 0x2e3   : > { %v2325_v25 = vpop.eup %2324  ;;  %2344 = vrcp.f32 %v1023_v39  ;;  %vm1005_vm0 = vcmp.eq.f32.partialorder %v3215_v41, 0.0  ;;  %vm1012_vm2 = vcmp.eq.f32.partialorder %v3195_v56, 0.0 }
 0x2e4   : > { %v2327_v52 = vpop.eup %2326  ;;  %2346 = vrcp.f32 %v1249_v18  ;;  %v981_v39 = vmul.f32 %v2325_v25, %v3180_v59  ;;  %v3263_v18 = vmin.f32 %v1029_v42, 0.99999  ;;  %v3272_v2 = vmin.f32 %v4304_v20, 0.99999 }
 0x2e5   : > { %v2329_v45 = vpop.eup %2328  ;;  %2348 = vrcp.f32 %v1247_v34  ;;  %v988_v30 = vmul.f32 %v2327_v52, %v3182_v6 }
 0x2e6   : > { %v2331_v9 = vpop.eup %2330  ;;  %2350 = vrcp.f32 %v1028_v44  ;;  %v992_v44 = vand.u32 2147483648, %v3182_v6  ;;  %v967_v25 = vmul.f32 %v2329_v45, %v3187_v19  ;;  %v983_v15 = vsel %vm982_vm3, %v3180_v59, %v981_v39 }
 0x2e7   : > { %v2333_v16 = vpop.eup %2332  ;;  %2352 = vrcp.f32 %v1029_v42  ;;  %v3276_v42 = vmin.f32 %v4356_v22, 0.99999  ;;  %v974_v52 = vmul.f32 %v2331_v9, %v3189_v26  ;;  %v971_v45 = vand.u32 2147483648, %v3187_v19 }
 0x2e8   : > { %v2335_v32 = vpop.eup %2334  ;;  %2354 = vrcp.f32 %v1252_v35  ;;  %v995_v20 = vmul.f32 %v2333_v16, %v3209_v14  ;;  %v990_v22 = vsel %vm989_vm5, %v3182_v6, %v988_v30  ;;  %v969_v39 = vsel %vm968_vm7, %v3187_v19, %v967_v25 }
 0x2e9   : > { %v2337_v34 = vpop.eup %2336  ;;  %v1002_v9 = vmul.f32 %v2335_v32, %v3215_v41  ;;  %v3304_v30 = vsel %vm984_vm4, %v985_v11, %v983_v15  ;;  %v976_v62 = vsel %vm975_vm9, %v3189_v26, %v974_v52  ;;  %v1013_v32 = vand.u32 2147483648, %v3195_v56 }
 0x2ea   : > { %v3280_v35 = vpop.eup %2338  ;;  %v1009_v4 = vmul.f32 %v2337_v34, %v3195_v56  ;;  %v3313_v25 = vsel %vm991_vm6, %v992_v44, %v990_v22  ;;  %v997_v60 = vsel %vm996_vm12, %v3209_v14, %v995_v20  ;;  %v3322_v59 = vsel %vm970_vm8, %v971_v45, %v969_v39 }
 0x2eb   : > { %v2341_v10 = vpop.eup %2340  ;;  %v999_v11 = vand.u32 2147483648, %v3209_v14  ;;  %v1004_v6 = vsel %vm1003_vm13, %v3215_v41, %v1002_v9  ;;  %v3332_v20 = vsel %vm977_vm10, %v978_v5, %v976_v62  ;;  %v1006_v52 = vand.u32 2147483648, %v3215_v41 }
 0x2ec   : > { %v3294_v7 = vpop.eup %2342  ;;  %v1016_v34 = vmul.f32 %v2341_v10, %v3198_v0  ;;  %v4312_v10 = vmax.f32 %v3304_v30, 1e-15  ;;  %v1011_v19 = vsel %vm1010_vm11, %v3195_v56, %v1009_v4  ;;  %v4314_v62 = vmax.f32 %v3322_v59, 1e-15 }
 0x2ed   : > { %v3300_v16 = vpop.eup %2344  ;;  %v3342_v22 = vsel %vm998_vm14, %v999_v11, %v997_v60  ;;  %v3348_v4 = vsel %vm1005_vm0, %v1006_v52, %v1004_v6  ;;  %v1253_v26 = vsub.f32 1.0, %v3263_v18  ;;  %v3352_v14 = vsel %vm1012_vm2, %v1013_v32, %v1011_v19 }
 0x2ee   : > { %v3309_v61 = vpop.eup %2346  ;;  %v1018_v5 = vsel %vm1017_vm15, %v3198_v0, %v1016_v34  ;;  %v1020_v60 = vand.u32 2147483648, %v3198_v0  ;;  %v1250_v11 = vsub.f32 1.0, %v3272_v2  ;;  %v3358_v41 = vmin.f32 %v4312_v10, 0.99999 }
 0x2ef   : > { %v3318_v15 = vpop.eup %2348  ;;  %vm1019_vm3 = vcmp.eq.f32.partialorder %v3198_v0, 0.0  ;;  %v1251_v34 = vsub.f32 1.0, %v3276_v42  ;;  %v4357_v6 = vmax.f32 %v3313_v25, 1e-15  ;;  %v4315_v32 = vmax.f32 %v3348_v4, 1e-15 }
 0x2f0   : > { %v3327_v44 = vpop.eup %2350  ;;  %v3365_v39 = vsel %vm1019_vm3, %v1020_v60, %v1018_v5  ;;  %v4358_v19 = vmax.f32 %v3249_v38, 1e-15  ;;  %v3372_v10 = vmin.f32 %v4314_v62, 0.99999  ;;  %v1267_v56 = vmul.f32 %v3247_v36, %v3256_v46 }
 0x2f1   : > { %v3338_v45 = vpop.eup %2352  ;;  %v1225_v52 = vmin.f32 %v4357_v6, 0.99999  ;;  %v4359_v57 = vmax.f32 %v3332_v20, 1e-15  ;;  %v1256_v5 = vsub.f32 1.0, %v3358_v41  ;;  %v1235_v37 = vadd.f32 1.0, %v3276_v42 }
 0x2f2   : > { %v2355_v9 = vpop.eup %2354  ;;  %2356 = vrcp.f32 %v4358_v19  ;;  %v4316_v38 = vmax.f32 %v3365_v39, 1e-15  ;;  %v4360_v60 = vmax.f32 %v3342_v22, 1e-15  ;;  %v3389_v0 = vmin.f32 %v4315_v32, 0.99999 }
 0x2f3   : > { %2358 = vrcp.f32 %v1253_v26  ;;  %v3379_v6 = vmin.f32 %v4359_v57, 0.99999  ;;  %v1257_v62 = vsub.f32 1.0, %v1225_v52  ;;  %v4361_v36 = vmax.f32 %v3251_v28, 1e-15 }
 0x2f4   : > { %2360 = vrcp.f32 %v1250_v11  ;;  %v3385_v19 = vmin.f32 %v4360_v60, 0.99999  ;;  %v1254_v57 = vsub.f32 1.0, %v3372_v10  ;;  %v4362_v46 = vmax.f32 %v3352_v14, 1e-15 }
 0x2f5   : > { %2362 = vrcp.f32 %v1251_v34  ;;  %v1255_v11 = vsub.f32 1.0, %v3379_v6  ;;  %v3401_v34 = vmin.f32 %v4316_v38, 0.99999  ;;  %v1230_v32 = vadd.f32 1.0, %v3202_v40 }
 0x2f6   : > { %2364 = vrcp.f32 %v4361_v36  ;;  %v3396_v26 = vmin.f32 %v4362_v46, 0.99999  ;;  %v1258_v60 = vsub.f32 1.0, %v3385_v19  ;;  %v1259_v28 = vsub.f32 1.0, %v3389_v0 }
 0x2f7   : > { %2366 = vlog2.f32 %v1267_v56  ;;  %v1263_v46 = vmul.f32 %v3280_v35, %v1230_v32  ;;  %v1233_v56 = vadd.f32 1.0, %v3218_v43  ;;  %v1231_v38 = vadd.f32 1.0, %v3221_v47 }
 0x2f8   : > { %2368 = vrcp.f32 %v1256_v5  ;;  %v1260_v36 = vsub.f32 1.0, %v3396_v26  ;;  %v1261_v53 = vsub.f32 1.0, %v3401_v34  ;;  %v1237_v35 = vadd.f32 1.0, %v3263_v18 }
 0x2f9   : > { %2370 = vrcp.f32 %v1257_v62  ;;  %v1269_v40 = vmul.f32 %v3309_v61, %v1233_v56  ;;  %v1236_v62 = vadd.f32 1.0, %v3237_v23  ;;  %v1265_v50 = vmul.f32 %v3318_v15, %v1231_v38 }
 0x2fa   : > { %2372 = vrcp.f32 %v1254_v57  ;;  %v1234_v47 = vadd.f32 1.0, %v3272_v2  ;;  %v1240_v18 = vadd.f32 1.0, %v3358_v41  ;;  %v1239_v56 = vadd.f32 1.0, %v3379_v6 }
 0x2fb   : > { %2374 = vrcp.f32 %v1255_v11  ;;  %v1275_v32 = vmul.f32 %v2355_v9, %v1236_v62  ;;  %v1241_v9 = vadd.f32 1.0, %v1225_v52  ;;  %v1242_v41 = vadd.f32 1.0, %v3385_v19 }
 0x2fc   : > { %v3409_v5 = vpop.eup %2356  ;;  %2376 = vrcp.f32 %v1258_v60  ;;  %v4364_v52 = vmax.f32 %v3313_v25, 1e-15  ;;  %v1245_v19 = vadd.f32 1.0, %v3401_v34  ;;  %v4365_v34 = vmax.f32 %v3322_v59, 1e-15 }
 0x2fd   : > { %v2359_v51 = vpop.eup %2358  ;;  %2378 = vrcp.f32 %v1259_v28 }
 0x2fe   : > { %v2361_v57 = vpop.eup %2360  ;;  %2380 = vrcp.f32 %v1260_v36  ;;  %v1277_v60 = vmul.f32 %v2359_v51, %v1237_v35  ;;  %v1238_v51 = vadd.f32 1.0, %v3372_v10  ;;  %v1243_v35 = vadd.f32 1.0, %v3389_v0 }
 0x2ff   : > { %v2363_v43 = vpop.eup %2362  ;;  %2382 = vlog2.f32 %v1263_v46  ;;  %v1271_v23 = vmul.f32 %v2361_v57, %v1234_v47 }
 0x300   : > { %v3418_v11 = vpop.eup %2364  ;;  %2384 = vrcp.f32 %v1261_v53  ;;  %v1273_v15 = vmul.f32 %v2363_v43, %v1235_v37  ;;  %v4363_v37 = vmax.f32 %v3304_v30, 1e-15  ;;  %v1244_v43 = vadd.f32 1.0, %v3396_v26 }
 0x301   : > { %v2367_v61 = vpop.eup %2366  ;;  %2386 = vlog2.f32 %v1269_v40 }
 0x302   : > { %v2369_v28 = vpop.eup %2368  ;;  %2388 = vlog2.f32 %v1265_v50 }
 0x303   : > { %v2371_v38 = vpop.eup %2370  ;;  %2390 = vlog2.f32 %v1275_v32  ;;  %v1283_v46 = vmul.f32 %v2369_v28, %v1240_v18 }
 0x304   : > { %v2373_v36 = vpop.eup %2372  ;;  %2392 = vlog2.f32 %v1277_v60  ;;  %v1285_v53 = vmul.f32 %v2371_v38, %v1241_v9 }
 0x305   : > { %v2375_v2 = vpop.eup %2374  ;;  %2394 = vlog2.f32 %v1271_v23  ;;  %v1279_v50 = vmul.f32 %v2373_v36, %v1238_v51 }
 0x306   : > { %v2377_v42 = vpop.eup %2376  ;;  %2396 = vlog2.f32 %v1273_v15  ;;  %v1281_v57 = vmul.f32 %v2375_v2, %v1239_v56  ;;  %v4366_v2 = vmax.f32 %v3332_v20, 1e-15 }
 0x307   : > { %v2379_v40 = vpop.eup %2378  ;;  %2398 = vrcp.f32 %v4363_v37  ;;  %v1287_v32 = vmul.f32 %v2377_v42, %v1242_v41 }
 0x308   : > { %v2381_v62 = vpop.eup %2380  ;;  %2400 = vrcp.f32 %v4364_v52  ;;  %v1289_v47 = vmul.f32 %v2379_v40, %v1243_v35 }
 0x309   : > { %v2383_v10 = vpop.eup %2382  ;;  %2402 = vlog2.f32 %v1283_v46  ;;  %v1291_v60 = vmul.f32 %v2381_v62, %v1244_v43  ;;  %v1299_v46 = vmul.f32 0.6931472, %v2367_v61 }
 0x30a   : > { %v2385_v6 = vpop.eup %2384  ;;  %2404 = vlog2.f32 %v1285_v53  ;;  %v1295_v51 = vmul.f32 0.6931472, %v2383_v10  ;;  %v4367_v53 = vmax.f32 %v3352_v14, 1e-15 }
 0x30b   : > { %v2387_v30 = vpop.eup %2386  ;;  %2406 = vlog2.f32 %v1279_v50  ;;  %v1293_v28 = vmul.f32 %v2385_v6, %v1245_v19  ;;  %v4368_v50 = vmax.f32 %v3365_v39, 1e-15  ;;  %v3453_v14 = vmul.f32 0.5, %v1299_v46 }
 0x30c   : > { %v2389_v23 = vpop.eup %2388  ;;  %2408 = vlog2.f32 %v1281_v57  ;;  %v1301_v56 = vmul.f32 0.6931472, %v2387_v30  ;;  %v3455_v35 = vmul.f32 0.5, %v1295_v51  ;;  %v4369_v39 = vmax.f32 %v3342_v22, 1e-15 }
 0x30d   : > { %v2391_v25 = vpop.eup %2390  ;;  %2410 = vlog2.f32 %v1287_v32  ;;  %v1297_v40 = vmul.f32 0.6931472, %v2389_v23  ;;  %v4370_v30 = vmax.f32 %v3348_v4, 1e-15 }
 0x30e   : > { %v2393_v15 = vpop.eup %2392  ;;  %2412 = vlog2.f32 %v1289_v47  ;;  %v1307_v59 = vmul.f32 0.6931472, %v2391_v25  ;;  %v3459_v43 = vmul.f32 0.5, %v1301_v56 }
 0x30f   : > { %v2395_v0 = vpop.eup %2394  ;;  %2414 = vlog2.f32 %v1291_v60  ;;  %v1309_v62 = vmul.f32 0.6931472, %v2393_v15  ;;  %v3461_v32 = vmul.f32 0.5, %v1297_v40 }
 0x310   : > { %v2397_v26 = vpop.eup %2396  ;;  %v1303_v61 = vmul.f32 0.6931472, %v2395_v0  ;;  %v3467_v19 = vmul.f32 0.5, %v1307_v59 }
 0x311   : > { %v3435_v18 = vpop.eup %2398  ;;  %v1305_v6 = vmul.f32 0.6931472, %v2397_v26  ;;  %v3469_v23 = vmul.f32 0.5, %v1309_v62 }
 0x312   : > { %v3437_v36 = vpop.eup %2400  ;;  %v3472_v22 = vmul.f32 0.5, %v1303_v61 }
 0x313   : > { %v2403_v9 = vpop.eup %2402  ;;  %v3481_v56 = vmul.f32 0.5, %v1305_v6 }
 0x314   : > { %v2405_v42 = vpop.eup %2404  ;;  %v1315_v25 = vmul.f32 0.6931472, %v2403_v9 }
 0x315   : > { %v2407_v37 = vpop.eup %2406  ;;  %v1317_v15 = vmul.f32 0.6931472, %v2405_v42 }
 0x316   : > { %v2409_v52 = vpop.eup %2408  ;;  %v1311_v0 = vmul.f32 0.6931472, %v2407_v37  ;;  %v3488_v37 = vmul.f32 0.5, %v1315_v25 }
 0x317   : > { %v2411_v57 = vpop.eup %2410 }
 0x318   : > { %v2413_v10 = vpop.eup %2412  ;;  %v1319_v4 = vmul.f32 0.6931472, %v2411_v57  ;;  %v3494_v61 = vmul.f32 0.5, %v1311_v0 }
 0x319   : > { %v2415_v47 = vpop.eup %2414  ;;  %v1321_v46 = vmul.f32 0.6931472, %v2413_v10 }
 0x31a   : > { %v1323_v40 = vmul.f32 0.6931472, %v2415_v47 }
 0x346   : > { %v3432_v38 = vpop.xlane.xlu0 %1058 }
 0x347   : > { %2416 = vrsqrt.f32 %v3432_v38  ;;  %vm1102_vm4 = vcmp.eq.f32.partialorder %v3432_v38, inf  ;;  %vm1104_vm5 = vcmp.eq.f32.partialorder %v3432_v38, 0.0 }
 0x348   : > { %2418 = vlog2.f32 %v1293_v28  ;;  %v3447_v41 = vpop.xlane.xlu1 %1060 }
 0x349   : > { %2420 = vrcp.f32 %v4365_v34  ;;  %vm1109_vm6 = vcmp.eq.f32.partialorder %v3447_v41, inf  ;;  %vm1111_vm7 = vcmp.eq.f32.partialorder %v3447_v41, 0.0 }
 0x34a   : > { %2422 = vrcp.f32 %v4366_v2  ;;  %v3450_v20 = vpop.xlane.xlu0 %1054  ;;  %v1313_v2 = vmul.f32 0.6931472, %v2409_v52  ;;  %v3492_v52 = vmul.f32 0.5, %v1317_v15  ;;  %v3513_v15 = vmul.f32 0.5, %v1323_v40 }
 0x34b   : > { %2424 = vrcp.f32 %v4367_v53  ;;  %v1105_v53 = vand.u32 2147483648, %v3432_v38  ;;  %vm1088_vm8 = vcmp.eq.f32.partialorder %v3450_v20, inf  ;;  %vm1090_vm9 = vcmp.eq.f32.partialorder %v3450_v20, 0.0 }
 0x34c   : > { %2426 = vrcp.f32 %v4368_v50  ;;  %v3465_v60 = vpop.xlane.xlu1 %1056  ;;  %v3502_v47 = vmul.f32 0.5, %v1313_v2  ;;  %v1112_v2 = vand.u32 2147483648, %v3447_v41 }
 0x34d   : > { %2428 = vrsqrt.f32 %v3447_v41  ;;  %vm1095_vm10 = vcmp.eq.f32.partialorder %v3465_v60, inf  ;;  %vm1097_vm11 = vcmp.eq.f32.partialorder %v3465_v60, 0.0 }
 0x34e   : > { %2430 = vrsqrt.f32 %v3450_v20  ;;  %v3479_v9 = vpop.xlane.xlu0 %1066 }
 0x34f   : > { %2432 = vrcp.f32 %v4369_v39  ;;  %vm1130_vm12 = vcmp.eq.f32.partialorder %v3479_v9, inf  ;;  %vm1132_vm13 = vcmp.eq.f32.partialorder %v3479_v9, 0.0  ;;  %v1133_v24 = vand.u32 2147483648, %v3479_v9 }
 0x350   : > { %2434 = vrcp.f32 %v4370_v30  ;;  %v3500_v6 = vpop.xlane.xlu1 %1068  ;;  %v3506_v30 = vmul.f32 0.5, %v1321_v46 }
 0x351   : > { %v2417_v28 = vpop.eup %2416  ;;  %2436 = vrsqrt.f32 %v3465_v60  ;;  %vm1137_vm14 = vcmp.eq.f32.partialorder %v3500_v6, inf  ;;  %vm1139_vm15 = vcmp.eq.f32.partialorder %v3500_v6, 0.0 }
 0x352   : > { %v2419_v34 = vpop.eup %2418  ;;  %v1101_v26 = vmul.f32 %v2417_v28, %v3432_v38  ;;  %2438 = vrsqrt.f32 %v3479_v9  ;;  %v3511_v28 = vpop.xlane.xlu0 %1062 }
 0x353   : > { %v3475_v51 = vpop.eup %2420  ;;  %v3496_v57 = vmul.f32 0.6931472, %v2419_v34  ;;  %2440 = vrsqrt.f32 %v3500_v6  ;;  %vm1116_vm0 = vcmp.eq.f32.partialorder %v3511_v28, inf  ;;  %vm1118_vm2 = vcmp.eq.f32.partialorder %v3511_v28, 0.0 }
 0x354   : > { %v3483_v50 = vpop.eup %2422  ;;  %v1103_v42 = vsel %vm1102_vm4, %v3432_v38, %v1101_v26  ;;  %v3504_v38 = vmul.f32 0.5, %v1319_v4  ;;  %2442 = vrsqrt.f32 %v3511_v28 }
 0x355   : > { %v3490_v59 = vpop.eup %2424  ;;  %v1106_v62 = vsel %vm1104_vm5, %v1105_v53, %v1103_v42  ;;  %v1091_v53 = vand.u32 2147483648, %v3450_v20  ;;  %v1098_v42 = vand.u32 2147483648, %v3465_v60 }
 0x356   : > { %v3498_v10 = vpop.eup %2426  ;;  %v1200_v39 = vmax.f32 %v1106_v62, 1e-15  ;;  %v3533_v62 = vpop.xlane.xlu1 %1064 }
 0x357   : > { %v2429_v25 = vpop.eup %2428  ;;  %2444 = vrsqrt.f32 %v3533_v62  ;;  %vm1123_vm3 = vcmp.eq.f32.partialorder %v3533_v62, inf  ;;  %vm1125_vm4 = vcmp.eq.f32.partialorder %v3533_v62, 0.0 }
 0x358   : > { %v2431_v0 = vpop.eup %2430  ;;  %v1360_v34 = vmul.f32 %v3234_v17, %v1200_v39  ;;  %v1108_v26 = vmul.f32 %v2429_v25, %v3447_v41  ;;  %2446 = vrcp.f32 %v1200_v39 }
 0x359   : > { %v3519_v4 = vpop.eup %2432  ;;  %v1087_v46 = vmul.f32 %v2431_v0, %v3450_v20 }
 0x35a   : > { %v3525_v40 = vpop.eup %2434  ;;  %v1110_v17 = vsel %vm1109_vm6, %v3447_v41, %v1108_v26  ;;  %v1376_v31 = vmul.f32 %v1360_v34, %v3453_v14 }
 0x35b   : > { %v2437_v25 = vpop.eup %2436  ;;  %v1113_v0 = vsel %vm1111_vm7, %v1112_v2, %v1110_v17  ;;  %v1089_v33 = vsel %vm1088_vm8, %v3450_v20, %v1087_v46  ;;  %v3554_v46 = vpop.xlane.xlu0 %1074 }
 0x35c   : > { %v1201_v29 = vmax.f32 %v1113_v0, 1e-15  ;;  %v1092_v26 = vsel %vm1090_vm9, %v1091_v53, %v1089_v33  ;;  %v1094_v27 = vmul.f32 %v2437_v25, %v3465_v60  ;;  %v2439_v41 = vpop.eup %2438  ;;  %v1140_v33 = vand.u32 2147483648, %v3500_v6  ;;  %v3556_v53 = vpop.xlane.xlu1 %1076 }
 0x35d   : > { %v1198_v14 = vmax.f32 %v1092_v26, 1e-15  ;;  %v1129_v2 = vmul.f32 %v2439_v41, %v3479_v9  ;;  %2448 = vtanh.f32 %v1376_v31  ;;  %v2441_v17 = vpop.eup %2440  ;;  %v1126_v41 = vand.u32 2147483648, %v3533_v62 }
 0x35e   : > { %v1096_v20 = vsel %vm1095_vm10, %v3465_v60, %v1094_v27  ;;  %v1361_v39 = vmul.f32 %v3294_v7, %v1201_v29  ;;  %v1119_v27 = vand.u32 2147483648, %v3511_v28  ;;  %2450 = vrsqrt.f32 %v3554_v46 }
 0x35f   : > { %v1099_v34 = vsel %vm1097_vm11, %v1098_v42, %v1096_v20  ;;  %v1131_v60 = vsel %vm1130_vm12, %v3479_v9, %v1129_v2  ;;  %2452 = vrsqrt.f32 %v3556_v53  ;;  %v1136_v31 = vmul.f32 %v2441_v17, %v3500_v6  ;;  %v2443_v42 = vpop.eup %2442  ;;  %v3573_v20 = vpop.xlane.xlu0 %1070 }
 0x360   : > { %v1199_v25 = vmax.f32 %v1099_v34, 1e-15  ;;  %2454 = vrcp.f32 %v1201_v29  ;;  %v1134_v7 = vsel %vm1132_vm13, %v1133_v24, %v1131_v60  ;;  %v1358_v0 = vmul.f32 %v3241_v48, %v1198_v14 }
 0x361   : > { %2456 = vrcp.f32 %v1198_v14  ;;  %v1204_v26 = vmax.f32 %v1134_v7, 1e-15  ;;  %v1138_v29 = vsel %vm1137_vm14, %v3500_v6, %v1136_v31  ;;  %v1115_v9 = vmul.f32 %v2443_v42, %v3511_v28  ;;  %v2445_v34 = vpop.eup %2444 }
 0x362   : > { %2458 = vrsqrt.f32 %v3573_v20  ;;  %v1377_v24 = vmul.f32 %v1361_v39, %v3459_v43  ;;  %v1359_v2 = vmul.f32 %v3300_v16, %v1199_v25  ;;  %v1141_v48 = vsel %vm1139_vm15, %v1140_v33, %v1138_v29  ;;  %v2447_v33 = vpop.eup %2446 }
 0x363   : > { %vm1158_vm5 = vcmp.eq.f32.partialorder %v3554_v46, inf  ;;  %vm1160_vm6 = vcmp.eq.f32.partialorder %v3554_v46, 0.0  ;;  %2460 = vrcp.f32 %v1199_v25  ;;  %v1205_v14 = vmax.f32 %v1141_v48, 1e-15 }
 0x364   : > { %v1117_v17 = vsel %vm1116_vm0, %v3511_v28, %v1115_v9  ;;  %v1122_v60 = vmul.f32 %v2445_v34, %v3533_v62  ;;  %2462 = vrcp.f32 %v1204_v26  ;;  %v1161_v16 = vand.u32 2147483648, %v3554_v46 }
 0x365   : > { %v1120_v43 = vsel %vm1118_vm2, %v1119_v27, %v1117_v17  ;;  %v1374_v6 = vmul.f32 %v1358_v0, %v3455_v35  ;;  %vm1165_vm7 = vcmp.eq.f32.partialorder %v3556_v53, inf  ;;  %2464 = vtanh.f32 %v1377_v24  ;;  %v3601_v27 = vpop.xlane.xlu1 %1072 }
 0x366   : > { %v1202_v39 = vmax.f32 %v1120_v43, 1e-15  ;;  %v1124_v25 = vsel %vm1123_vm3, %v3533_v62, %v1122_v60  ;;  %v1364_v31 = vmul.f32 %v3327_v44, %v1204_v26  ;;  %v1375_v35 = vmul.f32 %v1359_v2, %v3461_v32  ;;  %v3616_v2 = vpop.xlane.xlu0 %1078 }
 0x367   : > { %v2449_v7 = vpop.eup %2448  ;;  %v1127_v28 = vsel %vm1125_vm4, %v1126_v41, %v1124_v25  ;;  %2466 = vtanh.f32 %v1374_v6  ;;  %vm1167_vm8 = vcmp.eq.f32.partialorder %v3556_v53, 0.0  ;;  %v1168_v0 = vand.u32 2147483648, %v3556_v53 }
 0x368   : > { %v2451_v42 = vpop.eup %2450  ;;  %2468 = vrcp.f32 %v1205_v14  ;;  %vm1144_vm9 = vcmp.eq.f32.partialorder %v3573_v20, inf  ;;  %v1203_v9 = vmax.f32 %v1127_v28, 1e-15  ;;  %vm1146_vm10 = vcmp.eq.f32.partialorder %v3573_v20, 0.0 }
 0x369   : > { %v2453_v29 = vpop.eup %2452  ;;  %v1157_v44 = vmul.f32 %v2451_v42, %v3554_v46  ;;  %2470 = vrsqrt.f32 %v3601_v27  ;;  %v1365_v26 = vmul.f32 %v3338_v45, %v1205_v14  ;;  %v1147_v41 = vand.u32 2147483648, %v3573_v20  ;;  %v3626_v6 = vpop.xlane.xlu1 %1080 }
 0x36a   : > { %v2455_v62 = vpop.eup %2454  ;;  %2472 = vrcp.f32 %v1202_v39  ;;  %v1164_v32 = vmul.f32 %v2453_v29, %v3556_v53  ;;  %v1411_v48 = vmul.f32 %v2449_v7, %v2447_v33  ;;  %v1380_v17 = vmul.f32 %v1364_v31, %v3467_v19  ;;  %v3641_v31 = vpop.xlane.xlu0 %1082 }
 0x36b   : > { %v2457_v24 = vpop.eup %2456  ;;  %v1159_v34 = vsel %vm1158_vm5, %v3554_v46, %v1157_v44  ;;  %2474 = vtanh.f32 %v1375_v35  ;;  %v1362_v43 = vmul.f32 %v3409_v5, %v1202_v39  ;;  %vm1151_vm11 = vcmp.eq.f32.partialorder %v3601_v27, inf }
 0x36c   : > { %v2459_v60 = vpop.eup %2458  ;;  %v1162_v45 = vsel %vm1160_vm6, %v1161_v16, %v1159_v34  ;;  %v1166_v14 = vsel %vm1165_vm7, %v3556_v53, %v1164_v32  ;;  %2476 = vrsqrt.f32 %v3616_v2  ;;  %vm1153_vm12 = vcmp.eq.f32.partialorder %v3601_v27, 0.0 }
 0x36d   : > { %2478 = vrcp.f32 %v1203_v9  ;;  %v1208_v25 = vmax.f32 %v1162_v45, 1e-15  ;;  %v1169_v33 = vsel %vm1167_vm8, %v1168_v0, %v1166_v14  ;;  %v1143_v19 = vmul.f32 %v2459_v60, %v3573_v20  ;;  %v2461_v5 = vpop.eup %2460  ;;  %v3648_v0 = vpop.xlane.xlu1 %1084 }
 0x36e   : > { %v1209_v46 = vmax.f32 %v1169_v33, 1e-15  ;;  %v1154_v16 = vand.u32 2147483648, %v3601_v27  ;;  %2480 = vrsqrt.f32 %v3626_v6  ;;  %v3635_v39 = vpop.eup %2462  ;;  %v1363_v7 = vmul.f32 %v3418_v11, %v1203_v9 }
 0x36f   : > { %2482 = vrcp.f32 %v1208_v25  ;;  %v1145_v53 = vsel %vm1144_vm9, %v3573_v20, %v1143_v19  ;;  %v3644_v28 = vmul.f32 %v1411_v48, %v3032_v49  ;;  %v2465_v35 = vpop.eup %2464  ;;  %v1381_v29 = vmul.f32 %v1365_v26, %v3469_v23 }
 0x370   : > { %2484 = vrcp.f32 %v1209_v46  ;;  %v1148_v42 = vsel %vm1146_vm10, %v1147_v41, %v1145_v53  ;;  %v1378_v11 = vmul.f32 %v1362_v43, %v3472_v22  ;;  %v1368_v44 = vmul.f32 %v3435_v18, %v1208_v25 }
 0x371   : > { %v2467_v9 = vpop.eup %2466  ;;  %v1206_v32 = vmax.f32 %v1148_v42, 1e-15  ;;  %vm1172_vm13 = vcmp.eq.f32.partialorder %v3616_v2, inf  ;;  %2486 = vrsqrt.f32 %v3641_v31  ;;  %vm1174_vm14 = vcmp.eq.f32.partialorder %v3616_v2, 0.0 }
 0x372   : > { %v3655_v49 = vpop.eup %2468  ;;  %v1175_v20 = vand.u32 2147483648, %v3616_v2  ;;  %vm1179_vm15 = vcmp.eq.f32.partialorder %v3626_v6, inf  ;;  %2488 = vrsqrt.f32 %v3648_v0  ;;  %v1369_v22 = vmul.f32 %v3437_v36, %v1209_v46 }
 0x373   : > { %v2471_v23 = vpop.eup %2470  ;;  %2490 = vrcp.f32 %v1206_v32  ;;  %vm1181_vm0 = vcmp.eq.f32.partialorder %v3626_v6, 0.0  ;;  %v1182_v18 = vand.u32 2147483648, %v3626_v6  ;;  %v1456_v26 = vmul.f32 %v3644_v28, %v3644_v28 }
 0x374   : > { %v3666_v41 = vpop.eup %2472  ;;  %v1150_v34 = vmul.f32 %v2471_v23, %v3601_v27  ;;  %v1413_v48 = vmul.f32 %v2465_v35, %v2455_v62  ;;  %v1407_v60 = vmul.f32 %v2467_v9, %v2457_v24  ;;  %2492 = vtanh.f32 %v1380_v17 }
 0x375   : > { %v2475_v43 = vpop.eup %2474  ;;  %v1366_v45 = vmul.f32 %v3475_v51, %v1206_v32  ;;  %vm1186_vm2 = vcmp.eq.f32.partialorder %v3641_v31, inf  ;;  %1474 = vadd.xlane.f32.xlu0 %v1456_v26  ;;  %2494 = vtanh.f32 %v1381_v29  ;;  %v1379_v36 = vmul.f32 %v1363_v7, %v3481_v56 }
 0x376   : > { %v1384_v14 = vmul.f32 %v1368_v44, %v3488_v37  ;;  %v2477_v25 = vpop.eup %2476  ;;  %v1152_v33 = vsel %vm1151_vm11, %v3601_v27, %v1150_v34  ;;  %vm1188_vm3 = vcmp.eq.f32.partialorder %v3641_v31, 0.0  ;;  %v3678_v62 = vmul.f32 %v1413_v48, %v3045_v54 }
 0x377   : > { %v3681_v51 = vmul.f32 %v1407_v60, %v3050_v55  ;;  %v1409_v24 = vmul.f32 %v2475_v43, %v2461_v5  ;;  %v3683_v17 = vpop.eup %2478  ;;  %v1155_v56 = vsel %vm1153_vm12, %v1154_v16, %v1152_v33  ;;  %v1171_v37 = vmul.f32 %v2477_v25, %v3616_v2 }
 0x378   : > { %2496 = vtanh.f32 %v1378_v11  ;;  %v1385_v19 = vmul.f32 %v1369_v22, %v3492_v52  ;;  %v2481_v46 = vpop.eup %2480  ;;  %v1207_v7 = vmax.f32 %v1155_v56, 1e-15  ;;  %v1457_v54 = vmul.f32 %v3678_v62, %v3678_v62 }
 0x379   : > { %v1454_v55 = vmul.f32 %v3681_v51, %v3681_v51  ;;  %v3694_v5 = vmul.f32 %v1409_v24, %v3059_v58  ;;  %v3696_v53 = vpop.eup %2482  ;;  %v1173_v27 = vsel %vm1172_vm13, %v3616_v2, %v1171_v37  ;;  %v1178_v16 = vmul.f32 %v2481_v46, %v3626_v6 }
 0x37a   : > { %2498 = vtanh.f32 %v1379_v36  ;;  %v1382_v52 = vmul.f32 %v1366_v45, %v3494_v61  ;;  %v3703_v35 = vpop.eup %2484  ;;  %v1367_v42 = vmul.f32 %v3483_v50, %v1207_v7  ;;  %v1176_v58 = vsel %vm1174_vm14, %v1175_v20, %v1173_v27  ;;  %1476 = vadd.xlane.f32.xlu1 %v1457_v54 }
 0x37b   : > { %2500 = vrcp.f32 %v1207_v7  ;;  %1470 = vadd.xlane.f32.xlu0 %v1454_v55  ;;  %v1455_v29 = vmul.f32 %v3694_v5, %v3694_v5  ;;  %v2487_v11 = vpop.eup %2486  ;;  %v1210_v9 = vmax.f32 %v1176_v58, 1e-15  ;;  %v1180_v44 = vsel %vm1179_vm15, %v3626_v6, %v1178_v16 }
 0x37c   : > { %v1189_v61 = vand.u32 2147483648, %v3641_v31  ;;  %2502 = vtanh.f32 %v1384_v14  ;;  %v2489_v32 = vpop.eup %2488  ;;  %v1183_v50 = vsel %vm1181_vm0, %v1182_v18, %v1180_v44  ;;  %v1185_v2 = vmul.f32 %v2487_v11, %v3641_v31 }
 0x37d   : > { %vm1193_vm4 = vcmp.eq.f32.partialorder %v3648_v0, inf  ;;  %2504 = vtanh.f32 %v1385_v19  ;;  %v2491_v20 = vpop.eup %2490  ;;  %v1370_v23 = vmul.f32 %v3519_v4, %v1210_v9  ;;  %v1211_v22 = vmax.f32 %v1183_v50, 1e-15 }
 0x37e   : > { %v1192_v26 = vmul.f32 %v2489_v32, %v3648_v0  ;;  %v1383_v34 = vmul.f32 %v1367_v42, %v3502_v47  ;;  %v2493_v48 = vpop.eup %2492  ;;  %v1187_v60 = vsel %vm1186_vm2, %v3641_v31, %v1185_v2  ;;  %vm1195_vm5 = vcmp.eq.f32.partialorder %v3648_v0, 0.0  ;;  %1472 = vadd.xlane.f32.xlu1 %v1455_v29 }
 0x37f   : > { %v1196_v6 = vand.u32 2147483648, %v3648_v0  ;;  %2506 = vtanh.f32 %v1382_v52  ;;  %v2495_v18 = vpop.eup %2494  ;;  %v1371_v4 = vmul.f32 %v3525_v40, %v1211_v22  ;;  %v1190_v43 = vsel %vm1188_vm3, %v1189_v61, %v1187_v60  ;;  %v4371_v61 = vld [vmem:[#allocation20_spill] sm:$0xff] }
 0x380   : > { %2508 = vrcp.f32 %v1210_v9  ;;  %v1194_v47 = vsel %vm1193_vm4, %v3648_v0, %v1192_v26  ;;  %v1212_v45 = vmax.f32 %v1190_v43, 1e-15  ;;  %v1419_v14 = vmul.f32 %v2493_v48, %v3635_v39  ;;  %v4373_v26 = vld [vmem:[#allocation22_spill] sm:$0xff]  ;;  %v4375_v60 = vld [vmem:[#allocation24_spill] sm:$0xff] }
 0x381   : > { %v1197_v36 = vsel %vm1195_vm5, %v1196_v6, %v1194_v47  ;;  %v1421_v25 = vmul.f32 %v2495_v18, %v3655_v49  ;;  %2510 = vtanh.f32 %v1383_v34  ;;  %v1386_v56 = vmul.f32 %v1370_v23, %v3504_v38 }
 0x382   : > { %v2497_v33 = vpop.eup %2496  ;;  %v1213_v24 = vmax.f32 %v1197_v36, 1e-15  ;;  %v1387_v40 = vmul.f32 %v1371_v4, %v3506_v30  ;;  %2512 = vrcp.f32 %v1211_v22  ;;  %v1372_v31 = vmul.f32 %v3490_v59, %v1212_v45 }
 0x383   : > { %v3738_v37 = vmul.f32 %v1419_v14, %v3072_v63  ;;  %v3741_v0 = vmul.f32 %v1421_v25, %v3079_v1  ;;  %2514 = vrcp.f32 %v1212_v45  ;;  %v1415_v49 = vmul.f32 %v2497_v33, %v3666_v41  ;;  %v4377_v45 = vld [vmem:[#allocation25_spill] sm:$0xff]  ;;  %v4379_v14 = vld [vmem:[#allocation26_spill] sm:$0xff] }
 0x384   : > { %v2499_v19 = vpop.eup %2498  ;;  %v1373_v39 = vmul.f32 %v3498_v10, %v1213_v24  ;;  %v1341_v46 = vmul.f32 0.5, %v3496_v57  ;;  %2516 = vtanh.f32 %v1386_v56  ;;  %v1388_v10 = vmul.f32 %v1372_v31, %v3513_v15  ;;  %v3807_v56 = vld [vmem:[%s4296_s6] ss:$0 sm:$0xff] }
 0x385   : > { %v2501_v38 = vpop.eup %2500  ;;  %v1460_v30 = vmul.f32 %v3738_v37, %v3738_v37  ;;  %v1461_v59 = vmul.f32 %v3741_v0, %v3741_v0  ;;  %v1417_v63 = vmul.f32 %v2499_v19, %v3683_v17  ;;  %v3752_v7 = vmul.f32 %v1415_v49, %v3086_v3  ;;  %v4382_v19 = vld [vmem:[#allocation7_spill] sm:$0xff] }
 0x386   : > { %v2503_v1 = vpop.eup %2502  ;;  %2518 = vtanh.f32 %v1387_v40  ;;  %v1389_v41 = vmul.f32 %v1373_v39, %v1341_v46  ;;  %v4381_v40 = vld [vmem:[#allocation6_spill] sm:$0xff]  ;;  %v3815_v39 = vadd.f32 %v3807_v56, %v4382_v19  ;;  %v4383_v46 = vld [vmem:[#allocation8_spill] sm:$0xff] }
 0x387   : > { %v2505_v54 = vpop.eup %2504  ;;  %2520 = vrcp.f32 %v1213_v24  ;;  %1482 = vadd.xlane.f32.xlu0 %v1460_v30  ;;  %1484 = vadd.xlane.f32.xlu1 %v1461_v59  ;;  %v3756_v57 = vmul.f32 %v1417_v63, %v3099_v8  ;;  %v1427_v55 = vmul.f32 %v2503_v1, %v3696_v53  ;;  %v1458_v17 = vmul.f32 %v3752_v7, %v3752_v7  ;;  %v4384_v59 = vld [vmem:[#allocation9_spill] sm:$0xff] }
 0x388   : > { %v1429_v27 = vmul.f32 %v2505_v54, %v3703_v35  ;;  %2522 = vtanh.f32 %v1388_v10  ;;  %v3811_v31 = vadd.f32 %v3807_v56, %v4381_v40  ;;  %v1813_v30 = vand.u32 2147483647, %v3815_v39 }
 0x389   : > { %v2507_v3 = vpop.eup %2506  ;;  %v1459_v15 = vmul.f32 %v3756_v57, %v3756_v57  ;;  %v3765_v16 = vmul.f32 %v1427_v55, %v3110_v12  ;;  %2524 = vtanh.f32 %v1389_v41  ;;  %v3825_v63 = vadd.f32 %v3807_v56, %v4384_v59  ;;  %v4385_v41 = vld [vmem:[#allocation10_spill] sm:$0xff]  ;;  %v4386_v55 = vld [vmem:[#allocation11_spill] sm:$0xff] }
 0x38a   : > { %v2509_v52 = vpop.eup %2508  ;;  %v3768_v8 = vmul.f32 %v1429_v27, %v3115_v13  ;;  %v1423_v42 = vmul.f32 %v2507_v3, %v2491_v20  ;;  %v1815_v49 = vand.u32 2147483647, %v3811_v31  ;;  %v3830_v54 = vadd.f32 %v3807_v56, %v4385_v41 }
 0x38b   : > { %1478 = vadd.xlane.f32.xlu0 %v1458_v17  ;;  %1480 = vadd.xlane.f32.xlu1 %v1459_v15  ;;  %v1464_v53 = vmul.f32 %v3765_v16, %v3765_v16  ;;  %v2511_v35 = vpop.eup %2510  ;;  %v3834_v17 = vadd.f32 %v3807_v56, %v4386_v55  ;;  %v1829_v27 = vsub.f32 0.0, %v1813_v30  ;;  %v1814_v3 = vand.u32 2147483647, %v3825_v63  ;;  %v4392_v30 = vld [vmem:[#allocation17_spill] sm:$0xff] }
 0x38c   : > { %v1465_v58 = vmul.f32 %v3768_v8, %v3768_v8  ;;  %v3775_v29 = vmul.f32 %v1423_v42, %v3129_v21  ;;  %v2513_v12 = vpop.eup %2512  ;;  %v1425_v11 = vmul.f32 %v2511_v35, %v2501_v38  ;;  %v3820_v38 = vadd.f32 %v3807_v56, %v4383_v46  ;;  %v4387_v35 = vld [vmem:[#allocation12_spill] sm:$0xff] }
 0x38d   : > { %v2515_v9 = vpop.eup %2514  ;;  %v1831_v1 = vsub.f32 0.0, %v1815_v49  ;;  %v1819_v42 = vand.u32 2147483647, %v3830_v54  ;;  %v3866_v59 = vadd.f32 %v3807_v56, %v4392_v30 }
 0x38e   : > { %v2517_v44 = vpop.eup %2516  ;;  %v1462_v13 = vmul.f32 %v3775_v29, %v3775_v29  ;;  %v3780_v32 = vmul.f32 %v1425_v11, %v4371_v61  ;;  %v1816_v10 = vand.u32 2147483647, %v3820_v38 }
 0x38f   : > { %1490 = vadd.xlane.f32.xlu0 %v1464_v53  ;;  %1492 = vadd.xlane.f32.xlu1 %v1465_v58  ;;  %v1431_v2 = vmul.f32 %v2517_v44, %v2509_v52  ;;  %v1849_v15 = vmul.f32 1.442695, %v1831_v1  ;;  %v1817_v53 = vand.u32 2147483647, %v3834_v17  ;;  %v3841_v58 = vadd.f32 %v3807_v56, %v4387_v35 }
 0x390   : > { %4372 = vst [vmem:[#allocation20_spill] sm:$0xff] %v3780_v32  ;;  %v2519_v50 = vpop.eup %2518  ;;  %v1463_v23 = vmul.f32 %v3780_v32, %v3780_v32  ;;  %v1832_v52 = vsub.f32 0.0, %v1816_v10  ;;  %v1830_v44 = vsub.f32 0.0, %v1814_v3  ;;  %v1835_v61 = vsub.f32 0.0, %v1819_v42 }
 0x391   : > { %v2521_v20 = vpop.eup %2520  ;;  %v1433_v21 = vmul.f32 %v2519_v50, %v2513_v12  ;;  %v3785_v34 = vmul.f32 %v1431_v2, %v4373_v26  ;;  %v4388_v12 = vld [vmem:[#allocation13_spill] sm:$0xff]  ;;  %2526 = vpow2.f32 %v1849_v15  ;;  %v1833_v50 = vsub.f32 0.0, %v1817_v53  ;;  %v4390_v26 = vld [vmem:[#allocation15_spill] sm:$0xff] }
 0x392   : > { %v2523_v22 = vpop.eup %2522  ;;  %v3845_v11 = vadd.f32 %v3807_v56, %v4388_v12  ;;  %v1820_v2 = vand.u32 2147483647, %v3841_v58  ;;  %v1822_v15 = vand.u32 2147483647, %v3866_v59 }
 0x393   : > { %4374 = vst [vmem:[#allocation22_spill] sm:$0xff] %v3785_v34  ;;  %v2525_v48 = vpop.eup %2524  ;;  %1486 = vadd.xlane.f32.xlu0 %v1462_v13  ;;  %1488 = vadd.xlane.f32.xlu1 %v1463_v23  ;;  %v3788_v6 = vmul.f32 %v1433_v21, %v4375_v60  ;;  %v1435_v18 = vmul.f32 %v2523_v22, %v2515_v9  ;;  %v1845_v9 = vmul.f32 1.442695, %v1829_v27  ;;  %v1851_v13 = vmul.f32 1.442695, %v1832_v52  ;;  %v4389_v23 = vld [vmem:[#allocation14_spill] sm:$0xff] }
 0x394   : > { %v1466_v4 = vmul.f32 %v3785_v34, %v3785_v34  ;;  %v1437_v43 = vmul.f32 %v2525_v48, %v2521_v20  ;;  %v1818_v20 = vand.u32 2147483647, %v3845_v11  ;;  %v3851_v21 = vadd.f32 %v3807_v56, %v4389_v23  ;;  %v4395_v23 = vld [vmem:[#allocation19_spill] sm:$0xff] }
 0x395   : > { %4376 = vst [vmem:[#allocation24_spill] sm:$0xff] %v3788_v6  ;;  %v1467_v47 = vmul.f32 %v3788_v6, %v3788_v6  ;;  %v3795_v36 = vmul.f32 %v1435_v18, %v4377_v45  ;;  %2528 = vpow2.f32 %v1845_v9  ;;  %v1847_v22 = vmul.f32 1.442695, %v1830_v44  ;;  %v4391_v45 = vld [vmem:[#allocation16_spill] sm:$0xff] }
 0x396   : > { %v3798_v25 = vmul.f32 %v1437_v43, %v4379_v14  ;;  %v3855_v48 = vadd.f32 %v3807_v56, %v4390_v26  ;;  %2530 = vpow2.f32 %v1851_v13  ;;  %v1857_v60 = vmul.f32 1.442695, %v1835_v61  ;;  %v4393_v13 = vld [vmem:[#allocation18_spill] sm:$0xff] }
 0x397   : > { %4378 = vst [vmem:[#allocation25_spill] sm:$0xff] %v3795_v36  ;;  %1494 = vadd.xlane.f32.xlu0 %v1466_v4  ;;  %1496 = vadd.xlane.f32.xlu1 %v1467_v47  ;;  %v1468_v33 = vmul.f32 %v3795_v36, %v3795_v36  ;;  %v1853_v18 = vmul.f32 1.442695, %v1833_v50  ;;  %v1836_v4 = vsub.f32 0.0, %v1820_v2  ;;  %v1834_v43 = vsub.f32 0.0, %v1818_v20 }
 0x398   : > { %4380 = vst [vmem:[#allocation26_spill] sm:$0xff] %v3798_v25  ;;  %v1469_v24 = vmul.f32 %v3798_v25, %v3798_v25  ;;  %v1823_v47 = vand.u32 2147483647, %v3851_v21  ;;  %v3860_v14 = vadd.f32 %v3807_v56, %v4391_v45  ;;  %2532 = vpow2.f32 %v1847_v22  ;;  %v4396_v45 = vld [vmem:[#allocation21_spill] sm:$0xff] }
 0x399   : > { %2534 = vpow2.f32 %v1857_v60  ;;  %v1855_v19 = vmul.f32 1.442695, %v1834_v43  ;;  %v1838_v44 = vsub.f32 0.0, %v1822_v15  ;;  %v3871_v61 = vadd.f32 %v3807_v56, %v4393_v13 }
 0x39a   : > { %2536 = vpow2.f32 %v1853_v18  ;;  %v1839_v49 = vsub.f32 0.0, %v1823_v47  ;;  %v1824_v46 = vand.u32 2147483647, %v3860_v14  ;;  %v1827_v22 = vand.u32 2147483647, %v4395_v23 }
 0x39b   : > { %1498 = vadd.xlane.f32.xlu0 %v1468_v33  ;;  %1500 = vadd.xlane.f32.xlu1 %v1469_v24  ;;  %v1821_v33 = vand.u32 2147483647, %v3855_v48  ;;  %v1859_v24 = vmul.f32 1.442695, %v1836_v4  ;;  %v2527_v40 = vpop.eup %2526  ;;  %4394 = vst [vmem:[#allocation6_spill] sm:$0xff] %v3871_v61 }
 0x39c   : > { %v1879_v41 = vadd.f32 1.0, %v2527_v40  ;;  %v1865_v27 = vmul.f32 1.442695, %v1839_v49  ;;  %v1840_v3 = vsub.f32 0.0, %v1824_v46  ;;  %v1863_v26 = vmul.f32 1.442695, %v1838_v44 }
 0x39d   : > { %v1837_v1 = vsub.f32 0.0, %v1821_v33  ;;  %2538 = vpow2.f32 %v1859_v24  ;;  %v1825_v60 = vand.u32 2147483647, %v3871_v61  ;;  %v1843_v56 = vsub.f32 0.0, %v1827_v22 }
 0x39e   : > { %2540 = vpow2.f32 %v1855_v19  ;;  %v1867_v9 = vmul.f32 1.442695, %v1840_v3  ;;  %v1828_v33 = vand.u32 2147483647, %v4396_v45  ;;  %v4397_v19 = vld [vmem:[#allocation23_spill] sm:$0xff] }
 0x39f   : > { %v2529_v10 = vpop.eup %2528  ;;  %v1861_v52 = vmul.f32 1.442695, %v1837_v1  ;;  %2542 = vlog2.f32 %v1879_v41  ;;  %v1841_v40 = vsub.f32 0.0, %v1825_v60  ;;  %v1826_v49 = vand.u32 2147483647, %v4397_v19 }
 0x3a0   : > { %v2531_v55 = vpop.eup %2530  ;;  %v1877_v42 = vadd.f32 1.0, %v2529_v10  ;;  %2544 = vpow2.f32 %v1865_v27  ;;  %v1873_v27 = vmul.f32 1.442695, %v1843_v56  ;;  %v1844_v3 = vsub.f32 0.0, %v1828_v33 }
 0x3a1   : > { %v1880_v35 = vadd.f32 1.0, %v2531_v55  ;;  %2546 = vpow2.f32 %v1861_v52  ;;  %v1869_v52 = vmul.f32 1.442695, %v1841_v40 }
 0x3a2   : > { %v2533_v53 = vpop.eup %2532  ;;  %2548 = vlog2.f32 %v1877_v42  ;;  %v1842_v42 = vsub.f32 0.0, %v1826_v49 }
 0x3a3   : > { %v2535_v12 = vpop.eup %2534  ;;  %v1878_v2 = vadd.f32 1.0, %v2533_v53  ;;  %2550 = vlog2.f32 %v1880_v35 }
 0x3a4   : > { %v2537_v50 = vpop.eup %2536  ;;  %v1883_v20 = vadd.f32 1.0, %v2535_v12  ;;  %2552 = vpow2.f32 %v1867_v9 }
 0x3a5   : > { %v1881_v43 = vadd.f32 1.0, %v2537_v50  ;;  %v1875_v50 = vmul.f32 1.442695, %v1844_v3 }
 0x3a7   : > { %v2539_v4 = vpop.eup %2538 }
 0x3a8   : > { %v2541_v47 = vpop.eup %2540  ;;  %v1884_v24 = vadd.f32 1.0, %v2539_v4 }
 0x3a9   : > { %v3877_v46 = vpop.eup %2542  ;;  %v1882_v30 = vadd.f32 1.0, %v2541_v47 }
 0x3aa   : > { %v2545_v41 = vpop.eup %2544 }
 0x3ab   : > { %v2547_v55 = vpop.eup %2546  ;;  %v1887_v35 = vadd.f32 1.0, %v2545_v41 }
 0x3ac   : > { %v3882_v15 = vpop.eup %2548  ;;  %v1885_v44 = vadd.f32 1.0, %v2547_v55 }
 0x3ad   : > { %v3884_v53 = vpop.eup %2550 }
 0x3ae   : > { %v2553_v9 = vpop.eup %2552 }
 0x3af   : > { %v1888_v60 = vadd.f32 1.0, %v2553_v9 }
 0x402   : > { %v1475_v18 = vpop.xlane.xlu0 %1474 }
 0x403   : > { %2554 = vrsqrt.f32 %v1475_v18  ;;  %vm1518_vm6 = vcmp.eq.f32.partialorder %v1475_v18, inf  ;;  %v1521_v4 = vand.u32 2147483648, %v1475_v18  ;;  %vm1520_vm7 = vcmp.eq.f32.partialorder %v1475_v18, 0.0 }
 0x404   : > { %2556 = vlog2.f32 %v1878_v2 }
 0x405   : > { %2558 = vlog2.f32 %v1883_v20  ;;  %v1871_v20 = vmul.f32 1.442695, %v1842_v42 }
 0x406   : > { %2560 = vpow2.f32 %v1863_v26 }
 0x407   : > { %2562 = vlog2.f32 %v1881_v43  ;;  %v1477_v1 = vpop.xlane.xlu1 %1476 }
 0x408   : > { %v3879_v10 = vpop.xlane.xlu0 %1470  ;;  %2564 = vrsqrt.f32 %v1477_v1  ;;  %vm1525_vm8 = vcmp.eq.f32.partialorder %v1477_v1, inf  ;;  %vm1527_vm9 = vcmp.eq.f32.partialorder %v1477_v1, 0.0 }
 0x409   : > { %2566 = vrsqrt.f32 %v3879_v10  ;;  %vm1504_vm10 = vcmp.eq.f32.partialorder %v3879_v10, inf  ;;  %v1507_v9 = vand.u32 2147483648, %v3879_v10  ;;  %vm1506_vm11 = vcmp.eq.f32.partialorder %v3879_v10, 0.0 }
 0x40a   : > { %2568 = vlog2.f32 %v1884_v24 }
 0x40b   : > { %2570 = vlog2.f32 %v1882_v30  ;;  %v3886_v12 = vpop.xlane.xlu1 %1472 }
 0x40c   : > { %2572 = vrsqrt.f32 %v3886_v12  ;;  %vm1511_vm12 = vcmp.eq.f32.partialorder %v3886_v12, inf  ;;  %vm1513_vm13 = vcmp.eq.f32.partialorder %v3886_v12, 0.0 }
 0x40d   : > { %v2555_v13 = vpop.eup %2554  ;;  %2574 = vpow2.f32 %v1873_v27 }
 0x40e   : > { %v3889_v2 = vpop.eup %2556  ;;  %2576 = vpow2.f32 %v1869_v52  ;;  %v1517_v22 = vmul.f32 %v2555_v13, %v1475_v18 }
 0x40f   : > { %v3891_v26 = vpop.eup %2558  ;;  %2578 = vlog2.f32 %v1887_v35 }
 0x410   : > { %v2561_v43 = vpop.eup %2560  ;;  %2580 = vlog2.f32 %v1885_v44  ;;  %v1519_v47 = vsel %vm1518_vm6, %v1475_v18, %v1517_v22  ;;  %v1528_v18 = vand.u32 2147483648, %v1477_v1 }
 0x411   : > { %v3893_v56 = vpop.eup %2562  ;;  %2582 = vpow2.f32 %v1875_v50  ;;  %v1522_v33 = vsel %vm1520_vm7, %v1521_v4, %v1519_v47  ;;  %v1886_v30 = vadd.f32 1.0, %v2561_v43 }
 0x412   : > { %v2565_v24 = vpop.eup %2564  ;;  %2584 = vpow2.f32 %v1871_v20  ;;  %v1616_v40 = vmax.f32 %v1522_v33, 1e-15 }
 0x413   : > { %v2567_v49 = vpop.eup %2566  ;;  %2586 = vlog2.f32 %v1888_v60  ;;  %v1524_v41 = vmul.f32 %v2565_v24, %v1477_v1 }
 0x414   : > { %v3895_v55 = vpop.xlane.xlu0 %1482  ;;  %v3897_v27 = vpop.xlane.xlu1 %1484  ;;  %2588 = vtanh.f32 %v1616_v40  ;;  %v1503_v52 = vmul.f32 %v2567_v49, %v3879_v10 }
 0x415   : > { %v3899_v3 = vpop.eup %2568  ;;  %2590 = vrcp.f32 %v1616_v40  ;;  %v1526_v35 = vsel %vm1525_vm8, %v1477_v1, %v1524_v41  ;;  %v1898_v40 = vmul.f32 0.6931472, %v3877_v46  ;;  %vm1546_vm14 = vcmp.eq.f32.partialorder %v3895_v55, inf }
 0x416   : > { %v3902_v42 = vpop.eup %2570  ;;  %v1529_v13 = vsel %vm1527_vm9, %v1528_v18, %v1526_v35  ;;  %v1505_v50 = vsel %vm1504_vm10, %v3879_v10, %v1503_v52  ;;  %2592 = vrsqrt.f32 %v3895_v55  ;;  %v1514_v10 = vand.u32 2147483648, %v3886_v12 }
 0x417   : > { %v2573_v44 = vpop.eup %2572  ;;  %v1617_v22 = vmax.f32 %v1529_v13, 1e-15  ;;  %v1508_v60 = vsel %vm1506_vm11, %v1507_v9, %v1505_v50  ;;  %2594 = vrsqrt.f32 %v3897_v27  ;;  %v1894_v18 = vmul.f32 0.6931472, %v3882_v15 }
 0x418   : > { %v3909_v20 = vpop.eup %2574  ;;  %v1510_v4 = vmul.f32 %v2573_v44, %v3886_v12  ;;  %v3913_v1 = vpop.xlane.xlu0 %1478  ;;  %v1614_v33 = vmax.f32 %v1508_v60, 1e-15  ;;  %v1900_v52 = vmul.f32 0.6931472, %v3884_v53  ;;  %v1799_v44 = vmax.f32 %v3811_v31, 0.0 }
 0x419   : > { %v3915_v43 = vpop.xlane.xlu1 %1480  ;;  %v3917_v47 = vpop.eup %2576  ;;  %2596 = vrsqrt.f32 %v3913_v1  ;;  %v1800_v15 = vmax.f32 %v3820_v38, 0.0  ;;  %vm1548_vm15 = vcmp.eq.f32.partialorder %v3895_v55, 0.0  ;;  %vm1553_vm0 = vcmp.eq.f32.partialorder %v3897_v27, inf }
 0x41a   : > { %v3922_v24 = vpop.eup %2578  ;;  %2598 = vtanh.f32 %v1617_v22  ;;  %v1512_v49 = vsel %vm1511_vm12, %v3886_v12, %v1510_v4  ;;  %v1797_v12 = vmax.f32 %v3815_v39, 0.0  ;;  %vm1555_vm2 = vcmp.eq.f32.partialorder %v3897_v27, 0.0 }
 0x41b   : > { %v3927_v41 = vpop.eup %2580  ;;  %2600 = vrcp.f32 %v1617_v22  ;;  %v1515_v35 = vsel %vm1513_vm13, %v1514_v10, %v1512_v49  ;;  %v3944_v22 = vadd.f32 %v1898_v40, %v1799_v44  ;;  %v3949_v49 = vadd.f32 %v1900_v52, %v1800_v15 }
 0x41c   : > { %v3931_v9 = vpop.eup %2582  ;;  %2602 = vtanh.f32 %v1614_v33  ;;  %v1615_v13 = vmax.f32 %v1515_v35, 1e-15  ;;  %v3934_v46 = vpop.xlane.xlu0 %1490  ;;  %v3947_v10 = vadd.f32 %v1894_v18, %v1797_v12  ;;  %v3952_v35 = vmul.f32 0.6931472, %v3889_v2 }
 0x41d   : > { %4398 = vst [vmem:[#allocation7_spill] sm:$0xff] %v3931_v9  ;;  %v3936_v50 = vpop.xlane.xlu1 %1492  ;;  %v3938_v60 = vpop.eup %2584  ;;  %2604 = vlog2.f32 %v1886_v30  ;;  %v1549_v30 = vand.u32 2147483648, %v3895_v55  ;;  %v1556_v18 = vand.u32 2147483648, %v3897_v27  ;;  %vm1532_vm3 = vcmp.eq.f32.partialorder %v3913_v1, inf }
 0x41e   : > { %4399 = vst [vmem:[#allocation8_spill] sm:$0xff] %v3938_v60  ;;  %v3942_v53 = vpop.eup %2586  ;;  %2606 = vtanh.f32 %v1615_v13  ;;  %vm1534_vm4 = vcmp.eq.f32.partialorder %v3913_v1, 0.0  ;;  %v1535_v15 = vand.u32 2147483648, %v3913_v1  ;;  %vm1539_vm5 = vcmp.eq.f32.partialorder %v3915_v43, inf }
 0x41f   : > { %v2589_v31 = vpop.eup %2588  ;;  %2608 = vrcp.f32 %v1614_v33  ;;  %v1542_v45 = vand.u32 2147483648, %v3915_v43  ;;  %vm1541_vm6 = vcmp.eq.f32.partialorder %v3915_v43, 0.0  ;;  %vm1574_vm7 = vcmp.eq.f32.partialorder %v3934_v46, inf }
 0x420   : > { %v2591_v39 = vpop.eup %2590  ;;  %v1696_v25 = vmax.f32 %v2589_v31, 1e-15  ;;  %2610 = vrsqrt.f32 %v3915_v43  ;;  %v3961_v2 = vpop.xlane.xlu0 %1486  ;;  %vm1576_vm8 = vcmp.eq.f32.partialorder %v3934_v46, 0.0  ;;  %vm1581_vm9 = vcmp.eq.f32.partialorder %v3936_v50, inf }
 0x421   : > { %v2593_v38 = vpop.eup %2592  ;;  %2612 = vrsqrt.f32 %v3934_v46  ;;  %v3966_v52 = vpop.xlane.xlu1 %1488  ;;  %vm1583_vm10 = vcmp.eq.f32.partialorder %v3936_v50, 0.0  ;;  %vm1560_vm11 = vcmp.eq.f32.partialorder %v3961_v2, inf  ;;  %vm1562_vm12 = vcmp.eq.f32.partialorder %v3961_v2, 0.0 }
 0x422   : > { %v2595_v33 = vpop.eup %2594  ;;  %2614 = vrcp.f32 %v1696_v25  ;;  %v1545_v40 = vmul.f32 %v2593_v38, %v3895_v55  ;;  %vm1567_vm13 = vcmp.eq.f32.partialorder %v3966_v52, inf }
 0x423   : > { %v2597_v44 = vpop.eup %2596  ;;  %v1552_v12 = vmul.f32 %v2595_v33, %v3897_v27  ;;  %2616 = vrsqrt.f32 %v3936_v50 }
 0x424   : > { %v2599_v4 = vpop.eup %2598  ;;  %v1547_v25 = vsel %vm1546_vm14, %v3895_v55, %v1545_v40  ;;  %v1531_v38 = vmul.f32 %v2597_v44, %v3913_v1  ;;  %2618 = vrsqrt.f32 %v3961_v2  ;;  %vm1569_vm14 = vcmp.eq.f32.partialorder %v3966_v52, 0.0 }
 0x425   : > { %v2601_v33 = vpop.eup %2600  ;;  %v1697_v36 = vmax.f32 %v2599_v4, 1e-15  ;;  %v1550_v23 = vsel %vm1548_vm15, %v1549_v30, %v1547_v25  ;;  %v1554_v6 = vsel %vm1553_vm0, %v3897_v27, %v1552_v12  ;;  %2620 = vrsqrt.f32 %v3966_v52 }
 0x426   : > { %v2603_v40 = vpop.eup %2602  ;;  %2622 = vrcp.f32 %v1615_v13  ;;  %v1620_v44 = vmax.f32 %v1550_v23, 1e-15  ;;  %v1557_v19 = vsel %vm1555_vm2, %v1556_v18, %v1554_v6  ;;  %v1533_v34 = vsel %vm1532_vm3, %v3913_v1, %v1531_v38 }
 0x427   : > { %v3991_v55 = vpop.eup %2604  ;;  %2624 = vrcp.f32 %v1697_v36  ;;  %v1694_v30 = vmax.f32 %v2603_v40, 1e-15  ;;  %v3995_v12 = vsel %vm1534_vm4, %v1535_v15, %v1533_v34  ;;  %v1621_v23 = vmax.f32 %v1557_v19, 1e-15 }
 0x428   : > { %v2607_v25 = vpop.eup %2606  ;;  %2626 = vtanh.f32 %v1620_v44  ;;  %v1577_v6 = vand.u32 2147483648, %v3934_v46  ;;  %v1651_v13 = vmul.f32 %v2591_v39, %v2589_v31  ;;  %v1653_v18 = vmul.f32 %v2601_v33, %v2599_v4 }
 0x429   : > { %v2609_v27 = vpop.eup %2608  ;;  %2628 = vrcp.f32 %v1694_v30  ;;  %v1695_v36 = vmax.f32 %v2607_v25, 1e-15  ;;  %v1618_v1 = vmax.f32 %v3995_v12, 1e-15  ;;  %v1584_v34 = vand.u32 2147483648, %v3936_v50 }
 0x42a   : > { %v2611_v38 = vpop.eup %2610  ;;  %v1563_v39 = vand.u32 2147483648, %v3961_v2  ;;  %v1680_v30 = vmul.f32 %v1651_v13, %v3644_v28 }
 0x42b   : > { %v2613_v15 = vpop.eup %2612  ;;  %2630 = vrcp.f32 %v1695_v36  ;;  %v1538_v19 = vmul.f32 %v2611_v38, %v3915_v43  ;;  %v1681_v36 = vmul.f32 %v1653_v18, %v3678_v62  ;;  %v1647_v18 = vmul.f32 %v2609_v27, %v2603_v40 }
 0x42c   : > { %v2615_v4 = vpop.eup %2614  ;;  %2632 = vtanh.f32 %v1621_v23  ;;  %v1573_v31 = vmul.f32 %v2613_v15, %v3934_v46 }
 0x42d   : > { %v2617_v33 = vpop.eup %2616  ;;  %v1715_v12 = vmul.f32 0.996, %v2615_v4  ;;  %v1540_v38 = vsel %vm1539_vm5, %v3915_v43, %v1538_v19  ;;  %2634 = vtanh.f32 %v1618_v1 }
 0x42e   : > { %v2619_v61 = vpop.eup %2618  ;;  %v1543_v15 = vsel %vm1541_vm6, %v1542_v45, %v1540_v38  ;;  %v1575_v9 = vsel %vm1574_vm7, %v3934_v46, %v1573_v31  ;;  %v1580_v28 = vmul.f32 %v2617_v33, %v3936_v50  ;;  %2636 = vrcp.f32 %v1620_v44 }
 0x42f   : > { %v2621_v13 = vpop.eup %2620  ;;  %v1744_v62 = vmin.f32 %v1715_v12, 1.0  ;;  %v1619_v4 = vmax.f32 %v1543_v15, 1e-15  ;;  %v1578_v19 = vsel %vm1576_vm8, %v1577_v6, %v1575_v9  ;;  %v1559_v43 = vmul.f32 %v2619_v61, %v3961_v2 }
 0x430   : > { %v2623_v60 = vpop.eup %2622  ;;  %v1624_v32 = vmax.f32 %v1578_v19, 1e-15  ;;  %v1582_v45 = vsel %vm1581_vm9, %v3936_v50, %v1580_v28  ;;  %v1566_v9 = vmul.f32 %v2621_v13, %v3966_v52  ;;  %v1678_v13 = vmul.f32 %v1647_v18, %v3681_v51 }
 0x431   : > { %v2625_v31 = vpop.eup %2624  ;;  %v1760_v33 = vmul.f32 %v1744_v62, %v1680_v30  ;;  %2638 = vtanh.f32 %v1619_v4  ;;  %v1585_v40 = vsel %vm1583_vm10, %v1584_v34, %v1582_v45  ;;  %v1561_v27 = vsel %vm1560_vm11, %v3961_v2, %v1559_v43 }
 0x432   : > { %v4036_v46 = vpop.eup %2626  ;;  %v1717_v6 = vmul.f32 0.996, %v2625_v31  ;;  %2640 = vrcp.f32 %v1621_v23  ;;  %v1625_v44 = vmax.f32 %v1585_v40, 1e-15  ;;  %v1649_v38 = vmul.f32 %v2623_v60, %v2607_v25 }
 0x433   : > { %v2629_v12 = vpop.eup %2628  ;;  %v1943_v30 = vsel %vm845_vm1, %v1760_v33, %v3944_v22  ;;  %v1700_v50 = vmax.f32 %v4036_v46, 1e-15  ;;  %2642 = vtanh.f32 %v1624_v32  ;;  %v4051_v15 = vsel %vm1562_vm12, %v1563_v39, %v1561_v27 }
 0x434   : > { %1959 = vst [vmem:[%s4046_s9 + $0x10] sm:$0xff] %v1943_v30  ;;  %v1745_v34 = vmin.f32 %v1717_v6, 1.0  ;;  %v1711_v23 = vmul.f32 0.996, %v2629_v12  ;;  %2644 = vrcp.f32 %v1618_v1  ;;  %v1568_v60 = vsel %vm1567_vm13, %v3966_v52, %v1566_v9 }
 0x435   : > { %v2631_v28 = vpop.eup %2630  ;;  %2646 = vrcp.f32 %v1700_v50  ;;  %v1570_v22 = vand.u32 2147483648, %v3966_v52  ;;  %v1679_v2 = vmul.f32 %v1649_v38, %v3694_v5  ;;  %v1622_v39 = vmax.f32 %v4051_v15, 1e-15 }
 0x436   : > { %v2633_v25 = vpop.eup %2632  ;;  %v1761_v62 = vmul.f32 %v1745_v34, %v1681_v36  ;;  %v1742_v19 = vmin.f32 %v1711_v23, 1.0  ;;  %v1713_v45 = vmul.f32 0.996, %v2631_v28  ;;  %2648 = vtanh.f32 %v1625_v44  ;;  %v4095_v34 = vpop.xlane.xlu1 %1496 }
 0x437   : > { %v1701_v1 = vmax.f32 %v2633_v25, 1e-15  ;;  %2650 = vrcp.f32 %v1619_v4  ;;  %v4060_v51 = vpop.eup %2634  ;;  %v4067_v36 = vsel %vm1569_vm14, %v1570_v22, %v1568_v60  ;;  %v4401_v33 = vmax.f32 %v3825_v63, 0.0 }
 0x438   : > { %v1944_v18 = vsel %vm845_vm1, %v1761_v62, %v3949_v49  ;;  %v1758_v43 = vmul.f32 %v1742_v19, %v1678_v13  ;;  %v1743_v31 = vmin.f32 %v1713_v45, 1.0  ;;  %v1698_v5 = vmax.f32 %v4060_v51, 1e-15  ;;  %v2637_v4 = vpop.eup %2636 }
 0x439   : > { %1960 = vst [vmem:[%s4046_s9 + $0x18] sm:$0xff] %v1944_v18  ;;  %2652 = vrcp.f32 %v1701_v1  ;;  %v1926_v40 = vadd.f32 %v3952_v35, %v4401_v33  ;;  %v1803_v52 = vmax.f32 %v3830_v54, 0.0  ;;  %v1801_v27 = vmax.f32 %v3834_v17, 0.0 }
 0x43a   : > { %v1941_v9 = vsel %vm845_vm1, %v1758_v43, %v3947_v10  ;;  %v1759_v49 = vmul.f32 %v1743_v31, %v1679_v2  ;;  %2654 = vrcp.f32 %v1624_v32  ;;  %v1623_v12 = vmax.f32 %v4067_v36, 1e-15  ;;  %v4087_v32 = vpop.xlane.xlu0 %1494 }
 0x43b   : > { %v4077_v6 = vpop.eup %2638  ;;  %1957 = vst [vmem:[%s4046_s9] sm:$0xff] %v1941_v9  ;;  %2656 = vrcp.f32 %v1698_v5  ;;  %v1906_v35 = vmul.f32 0.6931472, %v3891_v26  ;;  %v1804_v54 = vmax.f32 %v3841_v58, 0.0  ;;  %v1802_v17 = vmax.f32 %v3845_v11, 0.0 }
 0x43c   : > { %v2641_v63 = vpop.eup %2640  ;;  %v1942_v30 = vsel %vm845_vm1, %v1759_v49, %v1926_v40  ;;  %v1699_v10 = vmax.f32 %v4077_v6, 1e-15  ;;  %2658 = vtanh.f32 %v1622_v39  ;;  %v1807_v50 = vmax.f32 %v3851_v21, 0.0 }
 0x43d   : > { %v4089_v38 = vpop.eup %2642  ;;  %1958 = vst [vmem:[%s4046_s9 + $0x8] sm:$0xff] %v1942_v30  ;;  %2660 = vrcp.f32 %v1625_v44  ;;  %v1902_v23 = vmul.f32 0.6931472, %v3893_v56  ;;  %v1659_v15 = vmul.f32 %v2637_v4, %v4036_v46  ;;  %v1908_v60 = vmul.f32 0.6931472, %v3899_v3 }
 0x43e   : > { %v2645_v26 = vpop.eup %2644  ;;  %2662 = vrcp.f32 %v1699_v10  ;;  %v1704_v28 = vmax.f32 %v4089_v38, 1e-15  ;;  %v1904_v58 = vmul.f32 0.6931472, %v3902_v42  ;;  %v1914_v11 = vmul.f32 0.6931472, %v3922_v24  ;;  %v4112_v2 = vpop.xlane.xlu0 %1498 }
 0x43f   : > { %v2647_v13 = vpop.eup %2646  ;;  %2664 = vtanh.f32 %v1623_v12  ;;  %v1931_v44 = vadd.f32 %v1906_v35, %v1803_v52  ;;  %v1808_v56 = vmax.f32 %v3860_v14, 0.0  ;;  %v1916_v62 = vmul.f32 0.6931472, %v3942_v53  ;;  %v4118_v53 = vpop.xlane.xlu1 %1500 }
 0x440   : > { %v4105_v21 = vpop.eup %2648  ;;  %v1723_v22 = vmul.f32 0.996, %v2647_v13  ;;  %2666 = vrcp.f32 %v1704_v28  ;;  %v1661_v19 = vmul.f32 %v2641_v63, %v2633_v25  ;;  %v1929_v42 = vadd.f32 %v1902_v23, %v1801_v27 }
 0x441   : > { %v2651_v46 = vpop.eup %2650  ;;  %v1705_v3 = vmax.f32 %v4105_v21, 1e-15  ;;  %2668 = vrcp.f32 %v1622_v39  ;;  %v1684_v24 = vmul.f32 %v1659_v15, %v3738_v37  ;;  %v1932_v18 = vadd.f32 %v1908_v60, %v1804_v54 }
 0x442   : > { %v1748_v45 = vmin.f32 %v1723_v22, 1.0  ;;  %2670 = vrsqrt.f32 %v4087_v32  ;;  %v4114_v14 = vadd.f32 %v1904_v58, %v1802_v17  ;;  %v4116_v43 = vadd.f32 %v1914_v11, %v1807_v50 }
 0x443   : > { %v2653_v1 = vpop.eup %2652  ;;  %2672 = vrcp.f32 %v1705_v3  ;;  %v1655_v37 = vmul.f32 %v2645_v26, %v4060_v51  ;;  %v4123_v4 = vmul.f32 0.6931472, %v3927_v41  ;;  %v4125_v33 = vadd.f32 %v1916_v62, %v1808_v56 }
 0x444   : > { %v2655_v25 = vpop.eup %2654  ;;  %v1764_v31 = vmul.f32 %v1748_v45, %v1684_v24  ;;  %v1725_v39 = vmul.f32 0.996, %v2653_v1  ;;  %2674 = vrsqrt.f32 %v4095_v34  ;;  %v1685_v40 = vmul.f32 %v1661_v19, %v3741_v0 }
 0x445   : > { %v2657_v5 = vpop.eup %2656  ;;  %2676 = vrsqrt.f32 %v4112_v2  ;;  %vm1588_vm15 = vcmp.eq.f32.partialorder %v4087_v32, inf  ;;  %v1657_v41 = vmul.f32 %v2651_v46, %v4077_v6  ;;  %vm1590_vm0 = vcmp.eq.f32.partialorder %v4087_v32, 0.0 }
 0x446   : > { %v4129_v9 = vpop.eup %2658  ;;  %v1947_v49 = vsel %vm845_vm1, %v1764_v31, %v1931_v44  ;;  %v1749_v52 = vmin.f32 %v1725_v39, 1.0  ;;  %v1719_v27 = vmul.f32 0.996, %v2657_v5  ;;  %2678 = vrsqrt.f32 %v4118_v53 }
 0x447   : > { %v2661_v51 = vpop.eup %2660  ;;  %1963 = vst [vmem:[%s4046_s9 + $0x30] sm:$0xff] %v1947_v49  ;;  %v1702_v63 = vmax.f32 %v4129_v9, 1e-15  ;;  %v1591_v0 = vand.u32 2147483648, %v4087_v32  ;;  %v1682_v10 = vmul.f32 %v1655_v37, %v3752_v7  ;;  %2680 = vrcp.f32 %v1623_v12 }
 0x448   : > { %v2663_v35 = vpop.eup %2662  ;;  %v1765_v30 = vmul.f32 %v1749_v52, %v1685_v40  ;;  %v1746_v54 = vmin.f32 %v1719_v27, 1.0  ;;  %vm1595_vm2 = vcmp.eq.f32.partialorder %v4095_v34, inf  ;;  %v1667_v50 = vmul.f32 %v2655_v25, %v4089_v38 }
 0x449   : > { %v4144_v17 = vpop.eup %2664  ;;  %v1721_v6 = vmul.f32 0.996, %v2663_v35  ;;  %2682 = vrcp.f32 %v1702_v63  ;;  %vm1597_vm3 = vcmp.eq.f32.partialorder %v4095_v34, 0.0  ;;  %v1598_v36 = vand.u32 2147483648, %v4095_v34 }
 0x44a   : > { %v2667_v26 = vpop.eup %2666  ;;  %v1948_v23 = vsel %vm845_vm1, %v1765_v30, %v1932_v18  ;;  %v1762_v7 = vmul.f32 %v1746_v54, %v1682_v10  ;;  %v1703_v15 = vmax.f32 %v4144_v17, 1e-15  ;;  %v1683_v28 = vmul.f32 %v1657_v41, %v3756_v57 }
 0x44b   : > { %v2669_v12 = vpop.eup %2668  ;;  %1964 = vst [vmem:[%s4046_s9 + $0x38] sm:$0xff] %v1948_v23  ;;  %v1747_v13 = vmin.f32 %v1721_v6, 1.0  ;;  %v1731_v60 = vmul.f32 0.996, %v2667_v26  ;;  %vm1602_vm4 = vcmp.eq.f32.partialorder %v4112_v2, inf  ;;  %v1669_v11 = vmul.f32 %v2661_v51, %v4105_v21 }
 0x44c   : > { %v2671_v38 = vpop.eup %2670  ;;  %v1945_v58 = vsel %vm845_vm1, %v1762_v7, %v1929_v42  ;;  %2684 = vrcp.f32 %v1703_v15  ;;  %vm1604_vm5 = vcmp.eq.f32.partialorder %v4112_v2, 0.0  ;;  %v1688_v22 = vmul.f32 %v1667_v50, %v3765_v16 }
 0x44d   : > { %v2673_v44 = vpop.eup %2672  ;;  %1961 = vst [vmem:[%s4046_s9 + $0x20] sm:$0xff] %v1945_v58  ;;  %v1763_v56 = vmul.f32 %v1747_v13, %v1683_v28  ;;  %v1752_v57 = vmin.f32 %v1731_v60, 1.0  ;;  %v1587_v46 = vmul.f32 %v2671_v38, %v4087_v32  ;;  %v1605_v3 = vand.u32 2147483648, %v4112_v2  ;;  %v4404_v58 = vld [vmem:[#allocation7_spill] sm:$0xff] }
 0x44e   : > { %v2675_v62 = vpop.eup %2674  ;;  %v1733_v19 = vmul.f32 0.996, %v2673_v44  ;;  %vm1609_vm6 = vcmp.eq.f32.partialorder %v4118_v53, inf  ;;  %v1612_v21 = vand.u32 2147483648, %v4118_v53  ;;  %v1689_v25 = vmul.f32 %v1669_v11, %v3768_v8 }
 0x44f   : > { %v2677_v42 = vpop.eup %2676  ;;  %v1946_v24 = vsel %vm845_vm1, %v1763_v56, %v4114_v14  ;;  %v1768_v45 = vmul.f32 %v1752_v57, %v1688_v22  ;;  %v1589_v16 = vsel %vm1588_vm15, %v4087_v32, %v1587_v46  ;;  %v1594_v1 = vmul.f32 %v2675_v62, %v4095_v34 }
 0x450   : > { %v2679_v18 = vpop.eup %2678  ;;  %1962 = vst [vmem:[%s4046_s9 + $0x28] sm:$0xff] %v1946_v24  ;;  %v1753_v31 = vmin.f32 %v1733_v19, 1.0  ;;  %v1592_v39 = vsel %vm1590_vm0, %v1591_v0, %v1589_v16  ;;  %v1601_v37 = vmul.f32 %v2677_v42, %v4112_v2  ;;  %v1663_v32 = vmul.f32 %v2669_v12, %v4129_v9 }
 0x451   : > { %v1951_v14 = vsel %vm845_vm1, %v1768_v45, %v4116_v43  ;;  %v1626_v5 = vmax.f32 %v1592_v39, 1e-15  ;;  %v1596_v40 = vsel %vm1595_vm2, %v4095_v34, %v1594_v1  ;;  %v1608_v49 = vmul.f32 %v2679_v18, %v4118_v53  ;;  %v2681_v52 = vpop.eup %2680 }
 0x452   : > { %1967 = vst [vmem:[%s4046_s9 + $0x50] sm:$0xff] %v1951_v14  ;;  %v1769_v8 = vmul.f32 %v1753_v31, %v1689_v25  ;;  %v1599_v27 = vsel %vm1597_vm3, %v1598_v36, %v1596_v40  ;;  %v1603_v43 = vsel %vm1602_vm4, %v4112_v2, %v1601_v37  ;;  %vm1611_vm7 = vcmp.eq.f32.partialorder %v4118_v53, 0.0  ;;  %v4402_v36 = vld [vmem:[#allocation20_spill] sm:$0xff]  ;;  %v4405_v37 = vld [vmem:[#allocation6_spill] sm:$0xff] }
 0x453   : > { %v2683_v51 = vpop.eup %2682  ;;  %2686 = vtanh.f32 %v1626_v5  ;;  %v1627_v41 = vmax.f32 %v1599_v27, 1e-15  ;;  %v1606_v63 = vsel %vm1604_vm5, %v1605_v3, %v1603_v43  ;;  %v1610_v0 = vsel %vm1609_vm6, %v4118_v53, %v1608_v49 }
 0x454   : > { %v1952_v9 = vsel %vm845_vm1, %v1769_v8, %v4125_v33  ;;  %v1727_v34 = vmul.f32 0.996, %v2683_v51  ;;  %v1628_v35 = vmax.f32 %v1606_v63, 1e-15  ;;  %v1805_v30 = vmax.f32 %v3855_v48, 0.0  ;;  %v4407_v63 = vld [vmem:[#allocation23_spill] sm:$0xff] }
 0x455   : > { %1968 = vst [vmem:[%s4046_s9 + $0x58] sm:$0xff] %v1952_v9  ;;  %v1665_v10 = vmul.f32 %v2681_v52, %v4144_v17  ;;  %2688 = vtanh.f32 %v1627_v41  ;;  %v1613_v2 = vsel %vm1611_vm7, %v1612_v21, %v1610_v0  ;;  %v1891_v6 = vadd.f32 1.0, %v3909_v20  ;;  %v4406_v52 = vld [vmem:[#allocation22_spill] sm:$0xff]  ;;  %v4408_v9 = vld [vmem:[#allocation24_spill] sm:$0xff] }
 0x456   : > { %v2685_v54 = vpop.eup %2684  ;;  %v1686_v50 = vmul.f32 %v1663_v32, %v3775_v29  ;;  %v1750_v26 = vmin.f32 %v1727_v34, 1.0  ;;  %v1629_v23 = vmax.f32 %v1613_v2, 1e-15  ;;  %v1912_v33 = vmul.f32 0.6931472, %v3991_v55  ;;  %v4403_v29 = vld [vmem:[#allocation8_spill] sm:$0xff] }
 0x457   : > { %v1889_v7 = vadd.f32 1.0, %v3917_v47  ;;  %v1729_v53 = vmul.f32 0.996, %v2685_v54  ;;  %2690 = vtanh.f32 %v1628_v35  ;;  %v1933_v48 = vadd.f32 %v4123_v4, %v1805_v30 }
 0x458   : > { %v1766_v15 = vmul.f32 %v1750_v26, %v1686_v50  ;;  %v1806_v17 = vmax.f32 %v3866_v59, 0.0  ;;  %v1687_v12 = vmul.f32 %v1665_v10, %v4402_v36  ;;  %2692 = vtanh.f32 %v1629_v23 }
 0x459   : > { %v1751_v20 = vmin.f32 %v1729_v53, 1.0  ;;  %2694 = vlog2.f32 %v1891_v6  ;;  %v1890_v28 = vadd.f32 1.0, %v4403_v29  ;;  %v1892_v11 = vadd.f32 1.0, %v4404_v58  ;;  %v4409_v6 = vld [vmem:[#allocation19_spill] sm:$0xff] }
 0x45a   : > { %v1949_v55 = vsel %vm845_vm1, %v1766_v15, %v1933_v48  ;;  %v1934_v13 = vadd.f32 %v1912_v33, %v1806_v17  ;;  %2696 = vlog2.f32 %v1889_v7  ;;  %v1809_v14 = vmax.f32 %v4405_v37, 0.0  ;;  %v4410_v33 = vld [vmem:[#allocation25_spill] sm:$0xff] }
 0x45b   : > { %1965 = vst [vmem:[%s4046_s9 + $0x40] sm:$0xff] %v1949_v55  ;;  %v1767_v47 = vmul.f32 %v1751_v20, %v1687_v12  ;;  %2698 = vrcp.f32 %v1626_v5  ;;  %v1810_v0 = vmax.f32 %v4407_v63, 0.0  ;;  %v1811_v50 = vmax.f32 %v4409_v6, 0.0  ;;  %v4411_v12 = vld [vmem:[#allocation21_spill] sm:$0xff]  ;;  %v4412_v55 = vld [vmem:[#allocation26_spill] sm:$0xff] }
 0x45c   : > { %2700 = vrcp.f32 %v1627_v41  ;;  %v1812_v20 = vmax.f32 %v4411_v12, 0.0 }
 0x45d   : > { %v2687_v4 = vpop.eup %2686  ;;  %v1950_v59 = vsel %vm845_vm1, %v1767_v47, %v1934_v13  ;;  %2702 = vlog2.f32 %v1890_v28 }
 0x45e   : > { %1966 = vst [vmem:[%s4046_s9 + $0x48] sm:$0xff] %v1950_v59  ;;  %v1706_v60 = vmax.f32 %v2687_v4, 1e-15  ;;  %2704 = vrcp.f32 %v1628_v35 }
 0x45f   : > { %v2689_v38 = vpop.eup %2688 }
 0x460   : > { %2706 = vrcp.f32 %v1706_v60  ;;  %v1707_v44 = vmax.f32 %v2689_v38, 1e-15 }
 0x461   : > { %v2691_v56 = vpop.eup %2690  ;;  %2708 = vrcp.f32 %v1629_v23 }
 0x462   : > { %2710 = vrcp.f32 %v1707_v44  ;;  %v1708_v22 = vmax.f32 %v2691_v56, 1e-15  ;;  %v2693_v57 = vpop.eup %2692 }
 0x463   : > { %2712 = vlog2.f32 %v1892_v11  ;;  %v2695_v46 = vpop.eup %2694  ;;  %v1709_v62 = vmax.f32 %v2693_v57, 1e-15 }
 0x464   : > { %2714 = vrcp.f32 %v1708_v22  ;;  %v2697_v19 = vpop.eup %2696  ;;  %v1922_v51 = vmul.f32 0.6931472, %v2695_v46 }
 0x465   : > { %v2699_v3 = vpop.eup %2698  ;;  %2716 = vrcp.f32 %v1709_v62  ;;  %v1918_v1 = vmul.f32 0.6931472, %v2697_v19 }
 0x466   : > { %v2701_v21 = vpop.eup %2700  ;;  %v1671_v45 = vmul.f32 %v2699_v3, %v2687_v4  ;;  %v1939_v36 = vadd.f32 %v1922_v51, %v1811_v50 }
 0x467   : > { %v2703_v42 = vpop.eup %2702  ;;  %v1673_v18 = vmul.f32 %v2701_v21, %v2689_v38  ;;  %v1937_v41 = vadd.f32 %v1918_v1, %v1809_v14 }
 0x468   : > { %v2705_v24 = vpop.eup %2704  ;;  %v1920_v5 = vmul.f32 0.6931472, %v2703_v42  ;;  %v1690_v8 = vmul.f32 %v1671_v45, %v4406_v52 }
 0x469   : > { %v1675_v40 = vmul.f32 %v2705_v24, %v2691_v56  ;;  %v1691_v34 = vmul.f32 %v1673_v18, %v4408_v9 }
 0x46a   : > { %v2707_v16 = vpop.eup %2706  ;;  %v1938_v23 = vadd.f32 %v1920_v5, %v1810_v0 }
 0x46b   : > { %v2709_v25 = vpop.eup %2708  ;;  %v1735_v31 = vmul.f32 0.996, %v2707_v16  ;;  %v1692_v7 = vmul.f32 %v1675_v40, %v4410_v33 }
 0x46c   : > { %v2711_v39 = vpop.eup %2710  ;;  %v1677_v2 = vmul.f32 %v2709_v25, %v2693_v57 }
 0x46d   : > { %v2713_v49 = vpop.eup %2712  ;;  %v1754_v32 = vmin.f32 %v1735_v31, 1.0  ;;  %v1737_v27 = vmul.f32 0.996, %v2711_v39 }
 0x46e   : > { %v2715_v43 = vpop.eup %2714  ;;  %v1924_v26 = vmul.f32 0.6931472, %v2713_v49  ;;  %v1693_v13 = vmul.f32 %v1677_v2, %v4412_v55 }
 0x46f   : > { %v1770_v35 = vmul.f32 %v1754_v32, %v1690_v8  ;;  %v1755_v30 = vmin.f32 %v1737_v27, 1.0  ;;  %v1739_v10 = vmul.f32 0.996, %v2715_v43  ;;  %v2717_v54 = vpop.eup %2716 }
 0x470   : > { %v1741_v17 = vmul.f32 0.996, %v2717_v54  ;;  %v1940_v4 = vadd.f32 %v1924_v26, %v1812_v20 }
 0x471   : > { %v1953_v53 = vsel %vm845_vm1, %v1770_v35, %v1937_v41  ;;  %v1771_v48 = vmul.f32 %v1755_v30, %v1691_v34  ;;  %v1756_v15 = vmin.f32 %v1739_v10, 1.0 }
 0x472   : > { %1969 = vst [vmem:[%s4046_s9 + $0x60] sm:$0xff] %v1953_v53  ;;  %v1757_v47 = vmin.f32 %v1741_v17, 1.0 }
 0x473   : > { %v1954_v29 = vsel %vm845_vm1, %v1771_v48, %v1938_v23  ;;  %v1772_v28 = vmul.f32 %v1756_v15, %v1692_v7 }
 0x474   : > { %1970 = vst [vmem:[%s4046_s9 + $0x68] sm:$0xff] %v1954_v29  ;;  %v1773_v60 = vmul.f32 %v1757_v47, %v1693_v13 }
 0x475   : > { %v1955_v59 = vsel %vm845_vm1, %v1772_v28, %v1939_v36 }
 0x476   : > { %1971 = vst [vmem:[%s4046_s9 + $0x70] sm:$0xff] %v1955_v59  ;;  %v1956_v38 = vsel %vm845_vm1, %v1773_v60, %v1940_v4 }
 0x477   : > { %1972 = vst [vmem:[%s4046_s9 + $0x78] sm:$0xff] %v1956_v38 }
 0x478   : > { %2732 = shalt.err (!%p2729_p3)
}
 0x479   : > { %s2733_s22 = scalar_lea.hbm %s4239_s17, 2048  ;;  %s2737_s8 = scalar_lea.hbm %s4297_s7, 4096 }
 0x47a   : > { %p2734_p4 = scmp.ne.s32.totalorder %s4239_s17, %s2733_s22  ;;  %p2738_p9 = scmp.lt.u32.totalorder %s4239_s17, %s4297_s7 }
 0x47b   : > { %p2739_p10 = scmp.lt.u32.totalorder %s2737_s8, %s2733_s22  ;;  %p2741_p12 = scmp.lt.u32.totalorder %s2733_s22, %s4239_s17 }
 0x47c   : > { %p2735_p7 = pnand %p2734_p4, %p2864_p5 }
 0x47d   : > { %p2740_p11 = por %p2739_p10, %p2738_p9 }
 0x47e   : > { %p2736_p8 = pneg %p2735_p7 }
 0x47f   : > { %p2742_p13 = por %p2741_p12, %p2740_p11 }
 0x481   : > { %p2743_p0 = pnand %p2742_p13, %p2736_p8 }
 0x483   : > { %2746 = shalt.err (!%p2743_p0)
}
 0x484   : > { %s2784_s16 = smov 128   ;;  %s2785_s13 = smov 8  }
 0x485   : > { %2241 = dma.vmem_to_hbm [thread:$0]  (%p2864_p5), %s4241_s15, 2048, %s4239_s17, %s4249_s28, %s2784_s16, %s2784_s16, %s2785_s13  }
 0x486 PF: > { %p2247_p1 = scmp.ge.s32.totalorder %s2781_s27, 2  ;;  %s2002_s18 = sand.u32 1, %s2769_s24  }
 0x487   : > { %s2003_s19 = scalar_lea.sflag [#allocation3], %s2002_s18 }
 0x488   : > { %p2244_p2 = pnand %p2247_p1, %p2868_p6 }
 0x48a   : > { %2764 = dma.done.wait (!%p2244_p2), %s2003_s19, 2048  }
 0x48b   : > { %2766 = vsyncadd (!%p2244_p2), %s2003_s19, 4294965248  ;;  %p17_p3 = scmp.ge.s32.totalorder %s2851_s30, 4   ;;  %s4413_s24 = smov %s2773_s25 }
 0x48c   : > { %s4414_s25 = smov %s2777_s26  ;;  %s4415_s26 = smov %s2862_s10 }
 0x48d   : > { %s4416_s27 = smov %s2851_s30  ;;  %19 = sbr.rel (!%p17_p3) target bundleno = 3 (0x3), region = 83 }
 0x494   :  { %2008 = vsyncpa [#allocation3], 1 }
 0x495   :  { %2010 = vsyncpa [#allocation3 + $0x1], 1 }

</bundles_post_ra>
